<compile_context>
chip_gen: v5e
topology: v5e:2x2
jax: 0.10.0
libtpu: 0.0.40
codegen_flags: <defaults>
</compile_context>

<pallas_src>
import functools

import jax
import jax.numpy as jnp
from jax import lax
from jax.experimental import pallas as pl
from jax.experimental.pallas import tpu as pltpu


# ----------------------------------------------------------------------------- #
# Small helpers (VMEM limit, single-buffered constant specs, chunk picking)
# ----------------------------------------------------------------------------- #
_VMEM_LIMIT = None


def _vmem_limit_bytes():
    """~75% of physical VMEM, capped at 100 MiB (=> ~96 MiB v5e/v6e, ~48 MiB v7x)."""
    global _VMEM_LIMIT
    if _VMEM_LIMIT is None:
        try:
            cap = int(pltpu.get_tpu_info().vmem_capacity_bytes)
            _VMEM_LIMIT = min(cap * 3 // 4, 100 << 20)
        except Exception:
            _VMEM_LIMIT = 48 << 20  # safe on every current chip
    return _VMEM_LIMIT


_BUFFERED1_OK = None


def _probe_buffered1():
    """Check that pipeline_mode=pl.Buffered(1) lowers & runs on this jax/libtpu."""
    try:
        const_spec = pl.BlockSpec((8, 128), lambda i: (0, 0),
                                  pipeline_mode=pl.Buffered(1))

        def k(c_ref, x_ref, o_ref):
            o_ref[...] = x_ref[...] + c_ref[...]

        fn = pl.pallas_call(
            k,
            out_shape=jax.ShapeDtypeStruct((16, 128), jnp.float32),
            grid=(2,),
            in_specs=[const_spec, pl.BlockSpec((8, 128), lambda i: (i, 0))],
            out_specs=pl.BlockSpec((8, 128), lambda i: (i, 0)),
        )
        jax.block_until_ready(
            fn(jnp.ones((8, 128), jnp.float32), jnp.ones((16, 128), jnp.float32)))
        return True
    except Exception:
        return False


def _const_spec(shape):
    """BlockSpec for a grid-invariant operand, single-buffered when supported."""
    global _BUFFERED1_OK
    if _BUFFERED1_OK is None:
        _BUFFERED1_OK = _probe_buffered1()
    index_map = lambda *_: (0,) * len(shape)
    if _BUFFERED1_OK:
        try:
            return pl.BlockSpec(shape, index_map, pipeline_mode=pl.Buffered(1))
        except Exception:
            pass
    return pl.BlockSpec(shape, index_map)


def _pick_time_chunk(seq, batch, max_chunk=32):
    """Largest legal time chunk: divides T and keeps the row block sublane-legal."""
    best = None
    for c in range(1, min(seq, max_chunk) + 1):
        if seq % c == 0 and (c * batch) % 8 == 0:
            best = c
    return best if best is not None else seq  # fallback: whole sequence in one block


# ----------------------------------------------------------------------------- #
# Kernels
# ----------------------------------------------------------------------------- #
def head_kernel(x_ref, w_ref, b_ref, o_ref):
    # Fused final Linear + LogSoftmax(dim=-1); full class width lives in one block.
    logits = (
        jnp.dot(x_ref[...], w_ref[...], preferred_element_type=jnp.float32)
        + b_ref[...]
    )
    m = jnp.max(logits, axis=-1, keepdims=True)
    s = logits - m
    lse = jnp.log(jnp.sum(jnp.exp(s), axis=-1, keepdims=True))
    o_ref[...] = s - lse


def gru_chunk_kernel(x_ref, wgi_ref, bgi_ref, whh_ref, bhn_ref, y_ref, h_ref,
                     *, t_chunk, batch, hidden):
    # Grid = (T // t_chunk,)  ["arbitrary"] -- state carried in VMEM scratch h_ref.
    #   x_ref   block: (t_chunk * B, Hin)  time-major layer input rows
    #   wgi_ref block: (Hin, 3H)           fused input-projection weight [r|z|n]
    #   bgi_ref block: (1, 3H)             b_ih (+ lin1 fold) + b_hh[r,z]
    #   whh_ref block: (H, 3H)             concatenated hidden weights [r|z|n]
    #   bhn_ref block: (1, H)              hidden bias of the n gate (r-gated)
    #   y_ref   block: (t_chunk, B, H)
    #   h_ref  scratch: (B, H)
    H = hidden
    B = batch

    @pl.when(pl.program_id(0) == 0)
    def _():
        h_ref[...] = jnp.zeros_like(h_ref)

    # Fused input projection for the whole chunk: one big MXU matmul, no HBM
    # round trip for the 3H-wide gi intermediate.
    gi = (
        jnp.dot(x_ref[...], wgi_ref[...], preferred_element_type=jnp.float32)
        + bgi_ref[...]
    )  # (t_chunk * B, 3H)

    whh = whh_ref[...]
    bhn = bhn_ref[...]
    h = h_ref[...]

    # Statically unrolled recurrence over the chunk (t_chunk <= 32 at compile time).
    for t in range(t_chunk):
        gi_t = gi[t * B:(t + 1) * B, :]                                   # (B, 3H)
        gh = jnp.dot(h, whh, preferred_element_type=jnp.float32)          # (B, 3H)
        r = jax.nn.sigmoid(gi_t[:, 0:H] + gh[:, 0:H])
        z = jax.nn.sigmoid(gi_t[:, H:2 * H] + gh[:, H:2 * H])
        n = jnp.tanh(gi_t[:, 2 * H:3 * H] + r * (gh[:, 2 * H:3 * H] + bhn))
        h = n + z * (h - n)                    # == (1 - z) * n + z * h_prev
        y_ref[t] = h

    h_ref[...] = h


# ----------------------------------------------------------------------------- #
# Wrappers
# ----------------------------------------------------------------------------- #
def head_pallas(x2d, w, b, row_block=512):
    """Row-tiled (rows x full-class-width) Linear + LogSoftmax, parallel row grid."""
    n, fin = x2d.shape
    fout = w.shape[1]
    rb = min(row_block, n)
    if rb != n and rb % 8 != 0:
        rb = n  # keep the sublane dim legal for small row counts
    return pl.pallas_call(
        head_kernel,
        out_shape=jax.ShapeDtypeStruct((n, fout), jnp.float32),
        grid_spec=pltpu.PrefetchScalarGridSpec(
            num_scalar_prefetch=0,
            grid=(pl.cdiv(n, rb),),
            in_specs=[
                pl.BlockSpec((rb, fin), lambda i: (i, 0)),
                _const_spec((fin, fout)),
                _const_spec((1, fout)),
            ],
            out_specs=pl.BlockSpec((rb, fout), lambda i: (i, 0)),
        ),
        compiler_params=pltpu.CompilerParams(
            dimension_semantics=("parallel",),
            vmem_limit_bytes=_vmem_limit_bytes(),
        ),
    )(x2d, w, b)


def gru_layer_pallas(x2d, w_gi, b_gi, w_hh, b_hh_n, *, batch, seq):
    """One GRU layer, fused input projection + time-chunked recurrence.

    x2d:     (T*B, Hin) time-major layer input (flattened)
    w_gi:    (Hin, 3H)  fused input-projection weight [r | z | n]
    b_gi:    (1, 3H)    fused input-projection bias (incl. r/z hidden biases)
    w_hh:    (H, 3H)    concatenated hidden weights [r | z | n]
    b_hh_n:  (1, H)     hidden bias of the n gate (gated by r)
    returns  (T, B, H)  time-major hidden states.
    """
    hin = w_gi.shape[0]
    H = w_hh.shape[0]
    assert x2d.shape == (seq * batch, hin)

    t_chunk = _pick_time_chunk(seq, batch)
    rows = t_chunk * batch

    kernel = functools.partial(
        gru_chunk_kernel, t_chunk=t_chunk, batch=batch, hidden=H)

    return pl.pallas_call(
        kernel,
        out_shape=jax.ShapeDtypeStruct((seq, batch, H), jnp.float32),
        grid_spec=pltpu.PrefetchScalarGridSpec(
            num_scalar_prefetch=0,
            grid=(seq // t_chunk,),
            in_specs=[
                pl.BlockSpec((rows, hin), lambda tc: (tc, 0)),
                _const_spec((hin, 3 * H)),
                _const_spec((1, 3 * H)),
                _const_spec((H, 3 * H)),
                _const_spec((1, H)),
            ],
            out_specs=pl.BlockSpec((t_chunk, batch, H), lambda tc: (tc, 0, 0)),
            scratch_shapes=[pltpu.VMEM((batch, H), jnp.float32)],
        ),
        compiler_params=pltpu.CompilerParams(
            dimension_semantics=("arbitrary",),   # time is a recurrence
            vmem_limit_bytes=_vmem_limit_bytes(),
        ),
    )(x2d, w_gi, b_gi, w_hh, b_hh_n)


# ----------------------------------------------------------------------------- #
# Parameters
# ----------------------------------------------------------------------------- #
def init_params(key, input_size, hidden_size, output_size, n_layers):
    """Torch-equivalent parameters (gate order [r, z, n], weights stored transposed)."""
    keys = jax.random.split(key, 4 + 4 * n_layers)
    scale = 0.1
    H = hidden_size
    params = {
        "w1": scale * jax.random.normal(keys[0], (input_size, H), jnp.float32),
        "b1": scale * jax.random.normal(keys[1], (1, H), jnp.float32),
        "w3": scale * jax.random.normal(keys[2], (H, output_size), jnp.float32),
        "b3": scale * jax.random.normal(keys[3], (1, output_size), jnp.float32),
        "gru": [],
    }
    for l in range(n_layers):
        k = keys[4 + 4 * l: 8 + 4 * l]
        hin = H  # GRU input size == hidden size (lin1 output) for every layer
        params["gru"].append({
            "w_ih": scale * jax.random.normal(k[0], (hin, 3 * H), jnp.float32),
            "w_hh": scale * jax.random.normal(k[1], (H, 3 * H), jnp.float32),
            "b_ih": scale * jax.random.normal(k[2], (1, 3 * H), jnp.float32),
            "b_hh": scale * jax.random.normal(k[3], (1, 3 * H), jnp.float32),
        })
    return params


def prepare_kernel_params(params):
    """Algebraic fusions for the kernel path (same f32 math as the reference):
       * fold lin1 into layer 0's input projection,
       * fold the r/z hidden biases into the input-projection bias."""
    H = params["w1"].shape[1]
    kp = {"w3": params["w3"], "b3": params["b3"], "gru": []}
    for l, layer in enumerate(params["gru"]):
        w_ih, w_hh = layer["w_ih"], layer["w_hh"]
        b_ih, b_hh = layer["b_ih"], layer["b_hh"]
        if l == 0:
            w_gi = params["w1"] @ w_ih                 # (In, 3H)
            b_gi = params["b1"] @ w_ih + b_ih          # (1, 3H)
        else:
            w_gi = w_ih
            b_gi = b_ih
        b_gi = b_gi.at[:, : 2 * H].add(b_hh[:, : 2 * H])  # r/z biases always summed
        kp["gru"].append({
            "w_gi": w_gi,
            "b_gi": b_gi,
            "w_hh": w_hh,
            "b_hh_n": b_hh[:, 2 * H:],                 # (1, H), gated by r
        })
    return kp


# ----------------------------------------------------------------------------- #
# Forward
# ----------------------------------------------------------------------------- #
@jax.jit
def classifier_forward(x, kparams):
    # x: (B, T, input_size) float32 -> log-probs (B, T, output_size)
    B, T, In = x.shape
    H = kparams["gru"][0]["w_hh"].shape[0]
    C = kparams["w3"].shape[1]

    # Time-major layout for the whole GRU stack: only the narrow In-wide input
    # and the C-wide output cross a transpose; no hidden-width HBM transposes,
    # and no gi intermediate hits HBM at all (fused into the GRU kernel).
    h = jnp.transpose(x, (1, 0, 2)).reshape(T * B, In)

    for layer in kparams["gru"]:
        y = gru_layer_pallas(h, layer["w_gi"], layer["b_gi"], layer["w_hh"],
                             layer["b_hh_n"], batch=B, seq=T)   # (T, B, H)
        h = y.reshape(T * B, H)                                 # free (row-major)

    out = head_pallas(h, kparams["w3"], kparams["b3"])          # (T*B, C)
    return jnp.transpose(out.reshape(T, B, C), (1, 0, 2))       # (B, T, C)


# ----------------------------------------------------------------------------- #
# Pure-JAX reference (unfused, torch-equivalent math)
# ----------------------------------------------------------------------------- #
def classifier_ref(x, params):
    H = params["w1"].shape[1]
    h = x @ params["w1"] + params["b1"]  # (B, T, H)

    def gru_layer_ref(xin, layer):
        w_ih, w_hh = layer["w_ih"], layer["w_hh"]
        b_ih, b_hh = layer["b_ih"], layer["b_hh"]

        def step(h_prev, x_t):
            gi = x_t @ w_ih + b_ih
            gh = h_prev @ w_hh + b_hh
            r = jax.nn.sigmoid(gi[:, :H] + gh[:, :H])
            z = jax.nn.sigmoid(gi[:, H:2 * H] + gh[:, H:2 * H])
            n = jnp.tanh(gi[:, 2 * H:] + r * gh[:, 2 * H:])
            h_new = (1.0 - z) * n + z * h_prev
            return h_new, h_new

        h0 = jnp.zeros((xin.shape[0], H), jnp.float32)
        _, ys = lax.scan(step, h0, jnp.swapaxes(xin, 0, 1))
        return jnp.swapaxes(ys, 0, 1)

    for layer in params["gru"]:
        h = gru_layer_ref(h, layer)

    logits = h @ params["w3"] + params["b3"]
    return jax.nn.log_softmax(logits, axis=2)


# ----------------------------------------------------------------------------- #
if __name__ == "__main__":
    B, T = 2, 8
    input_size, hidden_size, output_size, n_layers = 16, 32, 8, 2

    key = jax.random.PRNGKey(0)
    k_x, k_p = jax.random.split(key)
    x = jax.random.normal(k_x, (B, T, input_size), jnp.float32)

    params = init_params(k_p, input_size, hidden_size, output_size, n_layers)
    kparams = prepare_kernel_params(params)

    out = classifier_forward(x, kparams)
    out = jax.block_until_ready(out)

    ref = classifier_ref(x, params)
    assert out.shape == (B, T, output_size)
    assert jnp.allclose(out, ref, rtol=1e-4, atol=1e-4), "mismatch vs pure-JAX reference"

    print("KERNEL_OK")
</pallas_src>

<mosaic_0001>
module attributes {stable_mosaic.version = 11 : i64} {
  func.func @gru_chunk_kernel(%arg0: i32, %arg1: memref<16x16xf32, #tpu.memory_space<vmem>>, %arg2: memref<16x96xf32, #tpu.memory_space<vmem>>, %arg3: memref<1x96xf32, #tpu.memory_space<vmem>>, %arg4: memref<32x96xf32, #tpu.memory_space<vmem>>, %arg5: memref<1x32xf32, #tpu.memory_space<vmem>>, %arg6: memref<8x2x32xf32, #tpu.memory_space<vmem>>, %arg7: memref<2x32xf32, #tpu.memory_space<vmem>>) attributes {dimension_semantics = [#tpu.dimension_semantics<arbitrary>], iteration_bounds = array<i64: 1>, scalar_prefetch = 0 : i64, scratch_operands = 1 : i64, tpu.core_type = #tpu.core_type<tc>, window_params = [{transform_indices = @transform_0, window_bounds = array<i64: 16, 16>}, {pipeline_mode = #tpu.pipeline_mode<synchronous>, transform_indices = @transform_1, window_bounds = array<i64: 16, 96>}, {pipeline_mode = #tpu.pipeline_mode<synchronous>, transform_indices = @transform_2, window_bounds = array<i64: 1, 96>}, {pipeline_mode = #tpu.pipeline_mode<synchronous>, transform_indices = @transform_3, window_bounds = array<i64: 32, 96>}, {pipeline_mode = #tpu.pipeline_mode<synchronous>, transform_indices = @transform_4, window_bounds = array<i64: 1, 32>}, {transform_indices = @transform_5, window_bounds = array<i64: 8, 2, 32>}]} {
    %c0_i32 = arith.constant 0 : i32
    %0 = arith.cmpi eq, %arg0, %c0_i32 : i32
    %1 = arith.extui %0 : i1 to i32
    %c0_i32_0 = arith.constant 0 : i32
    %2 = arith.cmpi ne, %1, %c0_i32_0 : i32
    scf.if %2 {
      %cst_55 = arith.constant 0.000000e+00 : f32
      %261 = vector.broadcast %cst_55 : f32 to vector<2x32xf32>
      %c0_56 = arith.constant 0 : index
      %c0_57 = arith.constant 0 : index
      %262 = vector.load %arg7[%c0_56, %c0_57] : memref<2x32xf32, #tpu.memory_space<vmem>>, vector<2x32xf32>
      tpu.vector_store %arg7[%c0_56, %c0_57], %261 {strides = array<i32>} : memref<2x32xf32, #tpu.memory_space<vmem>>, vector<2x32xf32>,
    } else {
    }
    %c0 = arith.constant 0 : index
    %c0_1 = arith.constant 0 : index
    %3 = vector.load %arg1[%c0, %c0_1] : memref<16x16xf32, #tpu.memory_space<vmem>>, vector<16x16xf32>
    %c0_2 = arith.constant 0 : index
    %c0_3 = arith.constant 0 : index
    %4 = vector.load %arg2[%c0_2, %c0_3] : memref<16x96xf32, #tpu.memory_space<vmem>>, vector<16x96xf32>
    %cst = arith.constant dense<0.000000e+00> : vector<16x96xf32>
    %5 = tpu.matmul %3, %4, %cst {dimension_numbers = #tpu.dot_dimension_numbers<[1], [0], [0], [1], [0, 0, 1, 1], [], []>} : vector<16x16xf32>, vector<16x96xf32>, vector<16x96xf32> -> vector<16x96xf32>
    %c0_4 = arith.constant 0 : index
    %c0_5 = arith.constant 0 : index
    %6 = vector.load %arg3[%c0_4, %c0_5] : memref<1x96xf32, #tpu.memory_space<vmem>>, vector<1x96xf32>
    %7 = vector.broadcast %6 : vector<1x96xf32> to vector<16x96xf32>
    %8 = arith.addf %5, %7 : vector<16x96xf32>
    %c0_6 = arith.constant 0 : index
    %c0_7 = arith.constant 0 : index
    %9 = vector.load %arg4[%c0_6, %c0_7] : memref<32x96xf32, #tpu.memory_space<vmem>>, vector<32x96xf32>
    %c0_8 = arith.constant 0 : index
    %c0_9 = arith.constant 0 : index
    %10 = vector.load %arg5[%c0_8, %c0_9] : memref<1x32xf32, #tpu.memory_space<vmem>>, vector<1x32xf32>
    %c0_10 = arith.constant 0 : index
    %c0_11 = arith.constant 0 : index
    %11 = vector.load %arg7[%c0_10, %c0_11] : memref<2x32xf32, #tpu.memory_space<vmem>>, vector<2x32xf32>
    %12 = vector.extract_strided_slice %8 {offsets = [0, 0], sizes = [2, 96], strides = [1, 1]} : vector<16x96xf32> to vector<2x96xf32>
    %cst_12 = arith.constant dense<0.000000e+00> : vector<2x96xf32>
    %13 = tpu.matmul %11, %9, %cst_12 {dimension_numbers = #tpu.dot_dimension_numbers<[1], [0], [0], [1], [0, 0, 1, 1], [], []>} : vector<2x32xf32>, vector<32x96xf32>, vector<2x96xf32> -> vector<2x96xf32>
    %14 = vector.extract_strided_slice %12 {offsets = [0, 0], sizes = [2, 32], strides = [1, 1]} : vector<2x96xf32> to vector<2x32xf32>
    %15 = vector.extract_strided_slice %13 {offsets = [0, 0], sizes = [2, 32], strides = [1, 1]} : vector<2x96xf32> to vector<2x32xf32>
    %16 = arith.addf %14, %15 : vector<2x32xf32>
    %17 = arith.negf %16 : vector<2x32xf32>
    %18 = math.exp %17 : vector<2x32xf32>
    %cst_13 = arith.constant 1.000000e+00 : f32
    %19 = vector.broadcast %cst_13 : f32 to vector<2x32xf32>
    %20 = arith.addf %19, %18 : vector<2x32xf32>
    %21 = arith.divf %19, %20 : vector<2x32xf32>
    %22 = vector.extract_strided_slice %12 {offsets = [0, 32], sizes = [2, 32], strides = [1, 1]} : vector<2x96xf32> to vector<2x32xf32>
    %23 = vector.extract_strided_slice %13 {offsets = [0, 32], sizes = [2, 32], strides = [1, 1]} : vector<2x96xf32> to vector<2x32xf32>
    %24 = arith.addf %22, %23 : vector<2x32xf32>
    %25 = arith.negf %24 : vector<2x32xf32>
    %26 = math.exp %25 : vector<2x32xf32>
    %cst_14 = arith.constant 1.000000e+00 : f32
    %27 = vector.broadcast %cst_14 : f32 to vector<2x32xf32>
    %28 = arith.addf %27, %26 : vector<2x32xf32>
    %29 = arith.divf %27, %28 : vector<2x32xf32>
    %30 = vector.extract_strided_slice %12 {offsets = [0, 64], sizes = [2, 32], strides = [1, 1]} : vector<2x96xf32> to vector<2x32xf32>
    %31 = vector.extract_strided_slice %13 {offsets = [0, 64], sizes = [2, 32], strides = [1, 1]} : vector<2x96xf32> to vector<2x32xf32>
    %32 = vector.broadcast %10 : vector<1x32xf32> to vector<2x32xf32>
    %33 = arith.addf %31, %32 : vector<2x32xf32>
    %34 = arith.mulf %21, %33 : vector<2x32xf32>
    %35 = arith.addf %30, %34 : vector<2x32xf32>
    %36 = math.tanh %35 : vector<2x32xf32>
    %37 = arith.subf %11, %36 : vector<2x32xf32>
    %38 = arith.mulf %29, %37 : vector<2x32xf32>
    %39 = arith.addf %36, %38 : vector<2x32xf32>
    %c0_15 = arith.constant 0 : index
    %c0_16 = arith.constant 0 : index
    %c0_17 = arith.constant 0 : index
    %40 = vector.load %arg6[%c0_15, %c0_16, %c0_17] : memref<8x2x32xf32, #tpu.memory_space<vmem>>, vector<1x2x32xf32>
    %41 = vector.shape_cast %40 : vector<1x2x32xf32> to vector<2x32xf32>
    %42 = vector.shape_cast %39 : vector<2x32xf32> to vector<1x2x32xf32>
    tpu.vector_store %arg6[%c0_15, %c0_16, %c0_17], %42 {strides = array<i32>} : memref<8x2x32xf32, #tpu.memory_space<vmem>>, vector<1x2x32xf32>,
    %43 = vector.extract_strided_slice %8 {offsets = [2, 0], sizes = [2, 96], strides = [1, 1]} : vector<16x96xf32> to vector<2x96xf32>
    %cst_18 = arith.constant dense<0.000000e+00> : vector<2x96xf32>
    %44 = tpu.matmul %39, %9, %cst_18 {dimension_numbers = #tpu.dot_dimension_numbers<[1], [0], [0], [1], [0, 0, 1, 1], [], []>} : vector<2x32xf32>, vector<32x96xf32>, vector<2x96xf32> -> vector<2x96xf32>
    %45 = vector.extract_strided_slice %43 {offsets = [0, 0], sizes = [2, 32], strides = [1, 1]} : vector<2x96xf32> to vector<2x32xf32>
    %46 = vector.extract_strided_slice %44 {offsets = [0, 0], sizes = [2, 32], strides = [1, 1]} : vector<2x96xf32> to vector<2x32xf32>
    %47 = arith.addf %45, %46 : vector<2x32xf32>
    %48 = arith.negf %47 : vector<2x32xf32>
    %49 = math.exp %48 : vector<2x32xf32>
    %cst_19 = arith.constant 1.000000e+00 : f32
    %50 = vector.broadcast %cst_19 : f32 to vector<2x32xf32>
    %51 = arith.addf %50, %49 : vector<2x32xf32>
    %52 = arith.divf %50, %51 : vector<2x32xf32>
    %53 = vector.extract_strided_slice %43 {offsets = [0, 32], sizes = [2, 32], strides = [1, 1]} : vector<2x96xf32> to vector<2x32xf32>
    %54 = vector.extract_strided_slice %44 {offsets = [0, 32], sizes = [2, 32], strides = [1, 1]} : vector<2x96xf32> to vector<2x32xf32>
    %55 = arith.addf %53, %54 : vector<2x32xf32>
    %56 = arith.negf %55 : vector<2x32xf32>
    %57 = math.exp %56 : vector<2x32xf32>
    %cst_20 = arith.constant 1.000000e+00 : f32
    %58 = vector.broadcast %cst_20 : f32 to vector<2x32xf32>
    %59 = arith.addf %58, %57 : vector<2x32xf32>
    %60 = arith.divf %58, %59 : vector<2x32xf32>
    %61 = vector.extract_strided_slice %43 {offsets = [0, 64], sizes = [2, 32], strides = [1, 1]} : vector<2x96xf32> to vector<2x32xf32>
    %62 = vector.extract_strided_slice %44 {offsets = [0, 64], sizes = [2, 32], strides = [1, 1]} : vector<2x96xf32> to vector<2x32xf32>
    %63 = vector.broadcast %10 : vector<1x32xf32> to vector<2x32xf32>
    %64 = arith.addf %62, %63 : vector<2x32xf32>
    %65 = arith.mulf %52, %64 : vector<2x32xf32>
    %66 = arith.addf %61, %65 : vector<2x32xf32>
    %67 = math.tanh %66 : vector<2x32xf32>
    %68 = arith.subf %39, %67 : vector<2x32xf32>
    %69 = arith.mulf %60, %68 : vector<2x32xf32>
    %70 = arith.addf %67, %69 : vector<2x32xf32>
    %c1 = arith.constant 1 : index
    %c0_21 = arith.constant 0 : index
    %c0_22 = arith.constant 0 : index
    %71 = vector.load %arg6[%c1, %c0_21, %c0_22] : memref<8x2x32xf32, #tpu.memory_space<vmem>>, vector<1x2x32xf32>
    %72 = vector.shape_cast %71 : vector<1x2x32xf32> to vector<2x32xf32>
    %73 = vector.shape_cast %70 : vector<2x32xf32> to vector<1x2x32xf32>
    tpu.vector_store %arg6[%c1, %c0_21, %c0_22], %73 {strides = array<i32>} : memref<8x2x32xf32, #tpu.memory_space<vmem>>, vector<1x2x32xf32>,
    %74 = vector.extract_strided_slice %8 {offsets = [4, 0], sizes = [2, 96], strides = [1, 1]} : vector<16x96xf32> to vector<2x96xf32>
    %cst_23 = arith.constant dense<0.000000e+00> : vector<2x96xf32>
    %75 = tpu.matmul %70, %9, %cst_23 {dimension_numbers = #tpu.dot_dimension_numbers<[1], [0], [0], [1], [0, 0, 1, 1], [], []>} : vector<2x32xf32>, vector<32x96xf32>, vector<2x96xf32> -> vector<2x96xf32>
    %76 = vector.extract_strided_slice %74 {offsets = [0, 0], sizes = [2, 32], strides = [1, 1]} : vector<2x96xf32> to vector<2x32xf32>
    %77 = vector.extract_strided_slice %75 {offsets = [0, 0], sizes = [2, 32], strides = [1, 1]} : vector<2x96xf32> to vector<2x32xf32>
    %78 = arith.addf %76, %77 : vector<2x32xf32>
    %79 = arith.negf %78 : vector<2x32xf32>
    %80 = math.exp %79 : vector<2x32xf32>
    %cst_24 = arith.constant 1.000000e+00 : f32
    %81 = vector.broadcast %cst_24 : f32 to vector<2x32xf32>
    %82 = arith.addf %81, %80 : vector<2x32xf32>
    %83 = arith.divf %81, %82 : vector<2x32xf32>
    %84 = vector.extract_strided_slice %74 {offsets = [0, 32], sizes = [2, 32], strides = [1, 1]} : vector<2x96xf32> to vector<2x32xf32>
    %85 = vector.extract_strided_slice %75 {offsets = [0, 32], sizes = [2, 32], strides = [1, 1]} : vector<2x96xf32> to vector<2x32xf32>
    %86 = arith.addf %84, %85 : vector<2x32xf32>
    %87 = arith.negf %86 : vector<2x32xf32>
    %88 = math.exp %87 : vector<2x32xf32>
    %cst_25 = arith.constant 1.000000e+00 : f32
    %89 = vector.broadcast %cst_25 : f32 to vector<2x32xf32>
    %90 = arith.addf %89, %88 : vector<2x32xf32>
    %91 = arith.divf %89, %90 : vector<2x32xf32>
    %92 = vector.extract_strided_slice %74 {offsets = [0, 64], sizes = [2, 32], strides = [1, 1]} : vector<2x96xf32> to vector<2x32xf32>
    %93 = vector.extract_strided_slice %75 {offsets = [0, 64], sizes = [2, 32], strides = [1, 1]} : vector<2x96xf32> to vector<2x32xf32>
    %94 = vector.broadcast %10 : vector<1x32xf32> to vector<2x32xf32>
    %95 = arith.addf %93, %94 : vector<2x32xf32>
    %96 = arith.mulf %83, %95 : vector<2x32xf32>
    %97 = arith.addf %92, %96 : vector<2x32xf32>
    %98 = math.tanh %97 : vector<2x32xf32>
    %99 = arith.subf %70, %98 : vector<2x32xf32>
    %100 = arith.mulf %91, %99 : vector<2x32xf32>
    %101 = arith.addf %98, %100 : vector<2x32xf32>
    %c2 = arith.constant 2 : index
    %c0_26 = arith.constant 0 : index
    %c0_27 = arith.constant 0 : index
    %102 = vector.load %arg6[%c2, %c0_26, %c0_27] : memref<8x2x32xf32, #tpu.memory_space<vmem>>, vector<1x2x32xf32>
    %103 = vector.shape_cast %102 : vector<1x2x32xf32> to vector<2x32xf32>
    %104 = vector.shape_cast %101 : vector<2x32xf32> to vector<1x2x32xf32>
    tpu.vector_store %arg6[%c2, %c0_26, %c0_27], %104 {strides = array<i32>} : memref<8x2x32xf32, #tpu.memory_space<vmem>>, vector<1x2x32xf32>,
    %105 = vector.extract_strided_slice %8 {offsets = [6, 0], sizes = [2, 96], strides = [1, 1]} : vector<16x96xf32> to vector<2x96xf32>
    %cst_28 = arith.constant dense<0.000000e+00> : vector<2x96xf32>
    %106 = tpu.matmul %101, %9, %cst_28 {dimension_numbers = #tpu.dot_dimension_numbers<[1], [0], [0], [1], [0, 0, 1, 1], [], []>} : vector<2x32xf32>, vector<32x96xf32>, vector<2x96xf32> -> vector<2x96xf32>
    %107 = vector.extract_strided_slice %105 {offsets = [0, 0], sizes = [2, 32], strides = [1, 1]} : vector<2x96xf32> to vector<2x32xf32>
    %108 = vector.extract_strided_slice %106 {offsets = [0, 0], sizes = [2, 32], strides = [1, 1]} : vector<2x96xf32> to vector<2x32xf32>
    %109 = arith.addf %107, %108 : vector<2x32xf32>
    %110 = arith.negf %109 : vector<2x32xf32>
    %111 = math.exp %110 : vector<2x32xf32>
    %cst_29 = arith.constant 1.000000e+00 : f32
    %112 = vector.broadcast %cst_29 : f32 to vector<2x32xf32>
    %113 = arith.addf %112, %111 : vector<2x32xf32>
    %114 = arith.divf %112, %113 : vector<2x32xf32>
    %115 = vector.extract_strided_slice %105 {offsets = [0, 32], sizes = [2, 32], strides = [1, 1]} : vector<2x96xf32> to vector<2x32xf32>
    %116 = vector.extract_strided_slice %106 {offsets = [0, 32], sizes = [2, 32], strides = [1, 1]} : vector<2x96xf32> to vector<2x32xf32>
    %117 = arith.addf %115, %116 : vector<2x32xf32>
    %118 = arith.negf %117 : vector<2x32xf32>
    %119 = math.exp %118 : vector<2x32xf32>
    %cst_30 = arith.constant 1.000000e+00 : f32
    %120 = vector.broadcast %cst_30 : f32 to vector<2x32xf32>
    %121 = arith.addf %120, %119 : vector<2x32xf32>
    %122 = arith.divf %120, %121 : vector<2x32xf32>
    %123 = vector.extract_strided_slice %105 {offsets = [0, 64], sizes = [2, 32], strides = [1, 1]} : vector<2x96xf32> to vector<2x32xf32>
    %124 = vector.extract_strided_slice %106 {offsets = [0, 64], sizes = [2, 32], strides = [1, 1]} : vector<2x96xf32> to vector<2x32xf32>
    %125 = vector.broadcast %10 : vector<1x32xf32> to vector<2x32xf32>
    %126 = arith.addf %124, %125 : vector<2x32xf32>
    %127 = arith.mulf %114, %126 : vector<2x32xf32>
    %128 = arith.addf %123, %127 : vector<2x32xf32>
    %129 = math.tanh %128 : vector<2x32xf32>
    %130 = arith.subf %101, %129 : vector<2x32xf32>
    %131 = arith.mulf %122, %130 : vector<2x32xf32>
    %132 = arith.addf %129, %131 : vector<2x32xf32>
    %c3 = arith.constant 3 : index
    %c0_31 = arith.constant 0 : index
    %c0_32 = arith.constant 0 : index
    %133 = vector.load %arg6[%c3, %c0_31, %c0_32] : memref<8x2x32xf32, #tpu.memory_space<vmem>>, vector<1x2x32xf32>
    %134 = vector.shape_cast %133 : vector<1x2x32xf32> to vector<2x32xf32>
    %135 = vector.shape_cast %132 : vector<2x32xf32> to vector<1x2x32xf32>
    tpu.vector_store %arg6[%c3, %c0_31, %c0_32], %135 {strides = array<i32>} : memref<8x2x32xf32, #tpu.memory_space<vmem>>, vector<1x2x32xf32>,
    %136 = vector.extract_strided_slice %8 {offsets = [8, 0], sizes = [2, 96], strides = [1, 1]} : vector<16x96xf32> to vector<2x96xf32>
    %cst_33 = arith.constant dense<0.000000e+00> : vector<2x96xf32>
    %137 = tpu.matmul %132, %9, %cst_33 {dimension_numbers = #tpu.dot_dimension_numbers<[1], [0], [0], [1], [0, 0, 1, 1], [], []>} : vector<2x32xf32>, vector<32x96xf32>, vector<2x96xf32> -> vector<2x96xf32>
    %138 = vector.extract_strided_slice %136 {offsets = [0, 0], sizes = [2, 32], strides = [1, 1]} : vector<2x96xf32> to vector<2x32xf32>
    %139 = vector.extract_strided_slice %137 {offsets = [0, 0], sizes = [2, 32], strides = [1, 1]} : vector<2x96xf32> to vector<2x32xf32>
    %140 = arith.addf %138, %139 : vector<2x32xf32>
    %141 = arith.negf %140 : vector<2x32xf32>
    %142 = math.exp %141 : vector<2x32xf32>
    %cst_34 = arith.constant 1.000000e+00 : f32
    %143 = vector.broadcast %cst_34 : f32 to vector<2x32xf32>
    %144 = arith.addf %143, %142 : vector<2x32xf32>
    %145 = arith.divf %143, %144 : vector<2x32xf32>
    %146 = vector.extract_strided_slice %136 {offsets = [0, 32], sizes = [2, 32], strides = [1, 1]} : vector<2x96xf32> to vector<2x32xf32>
    %147 = vector.extract_strided_slice %137 {offsets = [0, 32], sizes = [2, 32], strides = [1, 1]} : vector<2x96xf32> to vector<2x32xf32>
    %148 = arith.addf %146, %147 : vector<2x32xf32>
    %149 = arith.negf %148 : vector<2x32xf32>
    %150 = math.exp %149 : vector<2x32xf32>
    %cst_35 = arith.constant 1.000000e+00 : f32
    %151 = vector.broadcast %cst_35 : f32 to vector<2x32xf32>
    %152 = arith.addf %151, %150 : vector<2x32xf32>
    %153 = arith.divf %151, %152 : vector<2x32xf32>
    %154 = vector.extract_strided_slice %136 {offsets = [0, 64], sizes = [2, 32], strides = [1, 1]} : vector<2x96xf32> to vector<2x32xf32>
    %155 = vector.extract_strided_slice %137 {offsets = [0, 64], sizes = [2, 32], strides = [1, 1]} : vector<2x96xf32> to vector<2x32xf32>
    %156 = vector.broadcast %10 : vector<1x32xf32> to vector<2x32xf32>
    %157 = arith.addf %155, %156 : vector<2x32xf32>
    %158 = arith.mulf %145, %157 : vector<2x32xf32>
    %159 = arith.addf %154, %158 : vector<2x32xf32>
    %160 = math.tanh %159 : vector<2x32xf32>
    %161 = arith.subf %132, %160 : vector<2x32xf32>
    %162 = arith.mulf %153, %161 : vector<2x32xf32>
    %163 = arith.addf %160, %162 : vector<2x32xf32>
    %c4 = arith.constant 4 : index
    %c0_36 = arith.constant 0 : index
    %c0_37 = arith.constant 0 : index
    %164 = vector.load %arg6[%c4, %c0_36, %c0_37] : memref<8x2x32xf32, #tpu.memory_space<vmem>>, vector<1x2x32xf32>
    %165 = vector.shape_cast %164 : vector<1x2x32xf32> to vector<2x32xf32>
    %166 = vector.shape_cast %163 : vector<2x32xf32> to vector<1x2x32xf32>
    tpu.vector_store %arg6[%c4, %c0_36, %c0_37], %166 {strides = array<i32>} : memref<8x2x32xf32, #tpu.memory_space<vmem>>, vector<1x2x32xf32>,
    %167 = vector.extract_strided_slice %8 {offsets = [10, 0], sizes = [2, 96], strides = [1, 1]} : vector<16x96xf32> to vector<2x96xf32>
    %cst_38 = arith.constant dense<0.000000e+00> : vector<2x96xf32>
    %168 = tpu.matmul %163, %9, %cst_38 {dimension_numbers = #tpu.dot_dimension_numbers<[1], [0], [0], [1], [0, 0, 1, 1], [], []>} : vector<2x32xf32>, vector<32x96xf32>, vector<2x96xf32> -> vector<2x96xf32>
    %169 = vector.extract_strided_slice %167 {offsets = [0, 0], sizes = [2, 32], strides = [1, 1]} : vector<2x96xf32> to vector<2x32xf32>
    %170 = vector.extract_strided_slice %168 {offsets = [0, 0], sizes = [2, 32], strides = [1, 1]} : vector<2x96xf32> to vector<2x32xf32>
    %171 = arith.addf %169, %170 : vector<2x32xf32>
    %172 = arith.negf %171 : vector<2x32xf32>
    %173 = math.exp %172 : vector<2x32xf32>
    %cst_39 = arith.constant 1.000000e+00 : f32
    %174 = vector.broadcast %cst_39 : f32 to vector<2x32xf32>
    %175 = arith.addf %174, %173 : vector<2x32xf32>
    %176 = arith.divf %174, %175 : vector<2x32xf32>
    %177 = vector.extract_strided_slice %167 {offsets = [0, 32], sizes = [2, 32], strides = [1, 1]} : vector<2x96xf32> to vector<2x32xf32>
    %178 = vector.extract_strided_slice %168 {offsets = [0, 32], sizes = [2, 32], strides = [1, 1]} : vector<2x96xf32> to vector<2x32xf32>
    %179 = arith.addf %177, %178 : vector<2x32xf32>
    %180 = arith.negf %179 : vector<2x32xf32>
    %181 = math.exp %180 : vector<2x32xf32>
    %cst_40 = arith.constant 1.000000e+00 : f32
    %182 = vector.broadcast %cst_40 : f32 to vector<2x32xf32>
    %183 = arith.addf %182, %181 : vector<2x32xf32>
    %184 = arith.divf %182, %183 : vector<2x32xf32>
    %185 = vector.extract_strided_slice %167 {offsets = [0, 64], sizes = [2, 32], strides = [1, 1]} : vector<2x96xf32> to vector<2x32xf32>
    %186 = vector.extract_strided_slice %168 {offsets = [0, 64], sizes = [2, 32], strides = [1, 1]} : vector<2x96xf32> to vector<2x32xf32>
    %187 = vector.broadcast %10 : vector<1x32xf32> to vector<2x32xf32>
    %188 = arith.addf %186, %187 : vector<2x32xf32>
    %189 = arith.mulf %176, %188 : vector<2x32xf32>
    %190 = arith.addf %185, %189 : vector<2x32xf32>
    %191 = math.tanh %190 : vector<2x32xf32>
    %192 = arith.subf %163, %191 : vector<2x32xf32>
    %193 = arith.mulf %184, %192 : vector<2x32xf32>
    %194 = arith.addf %191, %193 : vector<2x32xf32>
    %c5 = arith.constant 5 : index
    %c0_41 = arith.constant 0 : index
    %c0_42 = arith.constant 0 : index
    %195 = vector.load %arg6[%c5, %c0_41, %c0_42] : memref<8x2x32xf32, #tpu.memory_space<vmem>>, vector<1x2x32xf32>
    %196 = vector.shape_cast %195 : vector<1x2x32xf32> to vector<2x32xf32>
    %197 = vector.shape_cast %194 : vector<2x32xf32> to vector<1x2x32xf32>
    tpu.vector_store %arg6[%c5, %c0_41, %c0_42], %197 {strides = array<i32>} : memref<8x2x32xf32, #tpu.memory_space<vmem>>, vector<1x2x32xf32>,
    %198 = vector.extract_strided_slice %8 {offsets = [12, 0], sizes = [2, 96], strides = [1, 1]} : vector<16x96xf32> to vector<2x96xf32>
    %cst_43 = arith.constant dense<0.000000e+00> : vector<2x96xf32>
    %199 = tpu.matmul %194, %9, %cst_43 {dimension_numbers = #tpu.dot_dimension_numbers<[1], [0], [0], [1], [0, 0, 1, 1], [], []>} : vector<2x32xf32>, vector<32x96xf32>, vector<2x96xf32> -> vector<2x96xf32>
    %200 = vector.extract_strided_slice %198 {offsets = [0, 0], sizes = [2, 32], strides = [1, 1]} : vector<2x96xf32> to vector<2x32xf32>
    %201 = vector.extract_strided_slice %199 {offsets = [0, 0], sizes = [2, 32], strides = [1, 1]} : vector<2x96xf32> to vector<2x32xf32>
    %202 = arith.addf %200, %201 : vector<2x32xf32>
    %203 = arith.negf %202 : vector<2x32xf32>
    %204 = math.exp %203 : vector<2x32xf32>
    %cst_44 = arith.constant 1.000000e+00 : f32
    %205 = vector.broadcast %cst_44 : f32 to vector<2x32xf32>
    %206 = arith.addf %205, %204 : vector<2x32xf32>
    %207 = arith.divf %205, %206 : vector<2x32xf32>
    %208 = vector.extract_strided_slice %198 {offsets = [0, 32], sizes = [2, 32], strides = [1, 1]} : vector<2x96xf32> to vector<2x32xf32>
    %209 = vector.extract_strided_slice %199 {offsets = [0, 32], sizes = [2, 32], strides = [1, 1]} : vector<2x96xf32> to vector<2x32xf32>
    %210 = arith.addf %208, %209 : vector<2x32xf32>
    %211 = arith.negf %210 : vector<2x32xf32>
    %212 = math.exp %211 : vector<2x32xf32>
    %cst_45 = arith.constant 1.000000e+00 : f32
    %213 = vector.broadcast %cst_45 : f32 to vector<2x32xf32>
    %214 = arith.addf %213, %212 : vector<2x32xf32>
    %215 = arith.divf %213, %214 : vector<2x32xf32>
    %216 = vector.extract_strided_slice %198 {offsets = [0, 64], sizes = [2, 32], strides = [1, 1]} : vector<2x96xf32> to vector<2x32xf32>
    %217 = vector.extract_strided_slice %199 {offsets = [0, 64], sizes = [2, 32], strides = [1, 1]} : vector<2x96xf32> to vector<2x32xf32>
    %218 = vector.broadcast %10 : vector<1x32xf32> to vector<2x32xf32>
    %219 = arith.addf %217, %218 : vector<2x32xf32>
    %220 = arith.mulf %207, %219 : vector<2x32xf32>
    %221 = arith.addf %216, %220 : vector<2x32xf32>
    %222 = math.tanh %221 : vector<2x32xf32>
    %223 = arith.subf %194, %222 : vector<2x32xf32>
    %224 = arith.mulf %215, %223 : vector<2x32xf32>
    %225 = arith.addf %222, %224 : vector<2x32xf32>
    %c6 = arith.constant 6 : index
    %c0_46 = arith.constant 0 : index
    %c0_47 = arith.constant 0 : index
    %226 = vector.load %arg6[%c6, %c0_46, %c0_47] : memref<8x2x32xf32, #tpu.memory_space<vmem>>, vector<1x2x32xf32>
    %227 = vector.shape_cast %226 : vector<1x2x32xf32> to vector<2x32xf32>
    %228 = vector.shape_cast %225 : vector<2x32xf32> to vector<1x2x32xf32>
    tpu.vector_store %arg6[%c6, %c0_46, %c0_47], %228 {strides = array<i32>} : memref<8x2x32xf32, #tpu.memory_space<vmem>>, vector<1x2x32xf32>,
    %229 = vector.extract_strided_slice %8 {offsets = [14, 0], sizes = [2, 96], strides = [1, 1]} : vector<16x96xf32> to vector<2x96xf32>
    %cst_48 = arith.constant dense<0.000000e+00> : vector<2x96xf32>
    %230 = tpu.matmul %225, %9, %cst_48 {dimension_numbers = #tpu.dot_dimension_numbers<[1], [0], [0], [1], [0, 0, 1, 1], [], []>} : vector<2x32xf32>, vector<32x96xf32>, vector<2x96xf32> -> vector<2x96xf32>
    %231 = vector.extract_strided_slice %229 {offsets = [0, 0], sizes = [2, 32], strides = [1, 1]} : vector<2x96xf32> to vector<2x32xf32>
    %232 = vector.extract_strided_slice %230 {offsets = [0, 0], sizes = [2, 32], strides = [1, 1]} : vector<2x96xf32> to vector<2x32xf32>
    %233 = arith.addf %231, %232 : vector<2x32xf32>
    %234 = arith.negf %233 : vector<2x32xf32>
    %235 = math.exp %234 : vector<2x32xf32>
    %cst_49 = arith.constant 1.000000e+00 : f32
    %236 = vector.broadcast %cst_49 : f32 to vector<2x32xf32>
    %237 = arith.addf %236, %235 : vector<2x32xf32>
    %238 = arith.divf %236, %237 : vector<2x32xf32>
    %239 = vector.extract_strided_slice %229 {offsets = [0, 32], sizes = [2, 32], strides = [1, 1]} : vector<2x96xf32> to vector<2x32xf32>
    %240 = vector.extract_strided_slice %230 {offsets = [0, 32], sizes = [2, 32], strides = [1, 1]} : vector<2x96xf32> to vector<2x32xf32>
    %241 = arith.addf %239, %240 : vector<2x32xf32>
    %242 = arith.negf %241 : vector<2x32xf32>
    %243 = math.exp %242 : vector<2x32xf32>
    %cst_50 = arith.constant 1.000000e+00 : f32
    %244 = vector.broadcast %cst_50 : f32 to vector<2x32xf32>
    %245 = arith.addf %244, %243 : vector<2x32xf32>
    %246 = arith.divf %244, %245 : vector<2x32xf32>
    %247 = vector.extract_strided_slice %229 {offsets = [0, 64], sizes = [2, 32], strides = [1, 1]} : vector<2x96xf32> to vector<2x32xf32>
    %248 = vector.extract_strided_slice %230 {offsets = [0, 64], sizes = [2, 32], strides = [1, 1]} : vector<2x96xf32> to vector<2x32xf32>
    %249 = vector.broadcast %10 : vector<1x32xf32> to vector<2x32xf32>
    %250 = arith.addf %248, %249 : vector<2x32xf32>
    %251 = arith.mulf %238, %250 : vector<2x32xf32>
    %252 = arith.addf %247, %251 : vector<2x32xf32>
    %253 = math.tanh %252 : vector<2x32xf32>
    %254 = arith.subf %225, %253 : vector<2x32xf32>
    %255 = arith.mulf %246, %254 : vector<2x32xf32>
    %256 = arith.addf %253, %255 : vector<2x32xf32>
    %c7 = arith.constant 7 : index
    %c0_51 = arith.constant 0 : index
    %c0_52 = arith.constant 0 : index
    %257 = vector.load %arg6[%c7, %c0_51, %c0_52] : memref<8x2x32xf32, #tpu.memory_space<vmem>>, vector<1x2x32xf32>
    %258 = vector.shape_cast %257 : vector<1x2x32xf32> to vector<2x32xf32>
    %259 = vector.shape_cast %256 : vector<2x32xf32> to vector<1x2x32xf32>
    tpu.vector_store %arg6[%c7, %c0_51, %c0_52], %259 {strides = array<i32>} : memref<8x2x32xf32, #tpu.memory_space<vmem>>, vector<1x2x32xf32>,
    %c0_53 = arith.constant 0 : index
    %c0_54 = arith.constant 0 : index
    %260 = vector.load %arg7[%c0_53, %c0_54] : memref<2x32xf32, #tpu.memory_space<vmem>>, vector<2x32xf32>
    tpu.vector_store %arg7[%c0_53, %c0_54], %256 {strides = array<i32>} : memref<2x32xf32, #tpu.memory_space<vmem>>, vector<2x32xf32>,
    return
  }
  func.func @transform_0(%arg0: i32) -> (i32, i32) {
    %c0_i32 = arith.constant 0 : i32
    %c0_i32_0 = arith.constant 0 : i32
    return %arg0, %c0_i32 : i32, i32
  }
  func.func @transform_1(%arg0: i32) -> (i32, i32) {
    %c0_i32 = arith.constant 0 : i32
    %c0_i32_0 = arith.constant 0 : i32
    %c0_i32_1 = arith.constant 0 : i32
    return %c0_i32, %c0_i32_0 : i32, i32
  }
  func.func @transform_2(%arg0: i32) -> (i32, i32) {
    %c0_i32 = arith.constant 0 : i32
    %c0_i32_0 = arith.constant 0 : i32
    %c0_i32_1 = arith.constant 0 : i32
    return %c0_i32, %c0_i32_0 : i32, i32
  }
  func.func @transform_3(%arg0: i32) -> (i32, i32) {
    %c0_i32 = arith.constant 0 : i32
    %c0_i32_0 = arith.constant 0 : i32
    %c0_i32_1 = arith.constant 0 : i32
    return %c0_i32, %c0_i32_0 : i32, i32
  }
  func.func @transform_4(%arg0: i32) -> (i32, i32) {
    %c0_i32 = arith.constant 0 : i32
    %c0_i32_0 = arith.constant 0 : i32
    %c0_i32_1 = arith.constant 0 : i32
    return %c0_i32, %c0_i32_0 : i32, i32
  }
  func.func @transform_5(%arg0: i32) -> (i32, i32, i32) {
    %c0_i32 = arith.constant 0 : i32
    %c0_i32_0 = arith.constant 0 : i32
    %c0_i32_1 = arith.constant 0 : i32
    return %arg0, %c0_i32, %c0_i32_0 : i32, i32, i32
  }
}

module attributes {stable_mosaic.version = 11 : i64} {
  func.func @gru_chunk_kernel(%arg0: i32, %arg1: memref<16x32xf32, #tpu.memory_space<vmem>>, %arg2: memref<32x96xf32, #tpu.memory_space<vmem>>, %arg3: memref<1x96xf32, #tpu.memory_space<vmem>>, %arg4: memref<32x96xf32, #tpu.memory_space<vmem>>, %arg5: memref<1x32xf32, #tpu.memory_space<vmem>>, %arg6: memref<8x2x32xf32, #tpu.memory_space<vmem>>, %arg7: memref<2x32xf32, #tpu.memory_space<vmem>>) attributes {dimension_semantics = [#tpu.dimension_semantics<arbitrary>], iteration_bounds = array<i64: 1>, scalar_prefetch = 0 : i64, scratch_operands = 1 : i64, tpu.core_type = #tpu.core_type<tc>, window_params = [{transform_indices = @transform_0, window_bounds = array<i64: 16, 32>}, {pipeline_mode = #tpu.pipeline_mode<synchronous>, transform_indices = @transform_1, window_bounds = array<i64: 32, 96>}, {pipeline_mode = #tpu.pipeline_mode<synchronous>, transform_indices = @transform_2, window_bounds = array<i64: 1, 96>}, {pipeline_mode = #tpu.pipeline_mode<synchronous>, transform_indices = @transform_3, window_bounds = array<i64: 32, 96>}, {pipeline_mode = #tpu.pipeline_mode<synchronous>, transform_indices = @transform_4, window_bounds = array<i64: 1, 32>}, {transform_indices = @transform_5, window_bounds = array<i64: 8, 2, 32>}]} {
    %c0_i32 = arith.constant 0 : i32
    %0 = arith.cmpi eq, %arg0, %c0_i32 : i32
    %1 = arith.extui %0 : i1 to i32
    %c0_i32_0 = arith.constant 0 : i32
    %2 = arith.cmpi ne, %1, %c0_i32_0 : i32
    scf.if %2 {
      %cst_55 = arith.constant 0.000000e+00 : f32
      %261 = vector.broadcast %cst_55 : f32 to vector<2x32xf32>
      %c0_56 = arith.constant 0 : index
      %c0_57 = arith.constant 0 : index
      %262 = vector.load %arg7[%c0_56, %c0_57] : memref<2x32xf32, #tpu.memory_space<vmem>>, vector<2x32xf32>
      tpu.vector_store %arg7[%c0_56, %c0_57], %261 {strides = array<i32>} : memref<2x32xf32, #tpu.memory_space<vmem>>, vector<2x32xf32>,
    } else {
    }
    %c0 = arith.constant 0 : index
    %c0_1 = arith.constant 0 : index
    %3 = vector.load %arg1[%c0, %c0_1] : memref<16x32xf32, #tpu.memory_space<vmem>>, vector<16x32xf32>
    %c0_2 = arith.constant 0 : index
    %c0_3 = arith.constant 0 : index
    %4 = vector.load %arg2[%c0_2, %c0_3] : memref<32x96xf32, #tpu.memory_space<vmem>>, vector<32x96xf32>
    %cst = arith.constant dense<0.000000e+00> : vector<16x96xf32>
    %5 = tpu.matmul %3, %4, %cst {dimension_numbers = #tpu.dot_dimension_numbers<[1], [0], [0], [1], [0, 0, 1, 1], [], []>} : vector<16x32xf32>, vector<32x96xf32>, vector<16x96xf32> -> vector<16x96xf32>
    %c0_4 = arith.constant 0 : index
    %c0_5 = arith.constant 0 : index
    %6 = vector.load %arg3[%c0_4, %c0_5] : memref<1x96xf32, #tpu.memory_space<vmem>>, vector<1x96xf32>
    %7 = vector.broadcast %6 : vector<1x96xf32> to vector<16x96xf32>
    %8 = arith.addf %5, %7 : vector<16x96xf32>
    %c0_6 = arith.constant 0 : index
    %c0_7 = arith.constant 0 : index
    %9 = vector.load %arg4[%c0_6, %c0_7] : memref<32x96xf32, #tpu.memory_space<vmem>>, vector<32x96xf32>
    %c0_8 = arith.constant 0 : index
    %c0_9 = arith.constant 0 : index
    %10 = vector.load %arg5[%c0_8, %c0_9] : memref<1x32xf32, #tpu.memory_space<vmem>>, vector<1x32xf32>
    %c0_10 = arith.constant 0 : index
    %c0_11 = arith.constant 0 : index
    %11 = vector.load %arg7[%c0_10, %c0_11] : memref<2x32xf32, #tpu.memory_space<vmem>>, vector<2x32xf32>
    %12 = vector.extract_strided_slice %8 {offsets = [0, 0], sizes = [2, 96], strides = [1, 1]} : vector<16x96xf32> to vector<2x96xf32>
    %cst_12 = arith.constant dense<0.000000e+00> : vector<2x96xf32>
    %13 = tpu.matmul %11, %9, %cst_12 {dimension_numbers = #tpu.dot_dimension_numbers<[1], [0], [0], [1], [0, 0, 1, 1], [], []>} : vector<2x32xf32>, vector<32x96xf32>, vector<2x96xf32> -> vector<2x96xf32>
    %14 = vector.extract_strided_slice %12 {offsets = [0, 0], sizes = [2, 32], strides = [1, 1]} : vector<2x96xf32> to vector<2x32xf32>
    %15 = vector.extract_strided_slice %13 {offsets = [0, 0], sizes = [2, 32], strides = [1, 1]} : vector<2x96xf32> to vector<2x32xf32>
    %16 = arith.addf %14, %15 : vector<2x32xf32>
    %17 = arith.negf %16 : vector<2x32xf32>
    %18 = math.exp %17 : vector<2x32xf32>
    %cst_13 = arith.constant 1.000000e+00 : f32
    %19 = vector.broadcast %cst_13 : f32 to vector<2x32xf32>
    %20 = arith.addf %19, %18 : vector<2x32xf32>
    %21 = arith.divf %19, %20 : vector<2x32xf32>
    %22 = vector.extract_strided_slice %12 {offsets = [0, 32], sizes = [2, 32], strides = [1, 1]} : vector<2x96xf32> to vector<2x32xf32>
    %23 = vector.extract_strided_slice %13 {offsets = [0, 32], sizes = [2, 32], strides = [1, 1]} : vector<2x96xf32> to vector<2x32xf32>
    %24 = arith.addf %22, %23 : vector<2x32xf32>
    %25 = arith.negf %24 : vector<2x32xf32>
    %26 = math.exp %25 : vector<2x32xf32>
    %cst_14 = arith.constant 1.000000e+00 : f32
    %27 = vector.broadcast %cst_14 : f32 to vector<2x32xf32>
    %28 = arith.addf %27, %26 : vector<2x32xf32>
    %29 = arith.divf %27, %28 : vector<2x32xf32>
    %30 = vector.extract_strided_slice %12 {offsets = [0, 64], sizes = [2, 32], strides = [1, 1]} : vector<2x96xf32> to vector<2x32xf32>
    %31 = vector.extract_strided_slice %13 {offsets = [0, 64], sizes = [2, 32], strides = [1, 1]} : vector<2x96xf32> to vector<2x32xf32>
    %32 = vector.broadcast %10 : vector<1x32xf32> to vector<2x32xf32>
    %33 = arith.addf %31, %32 : vector<2x32xf32>
    %34 = arith.mulf %21, %33 : vector<2x32xf32>
    %35 = arith.addf %30, %34 : vector<2x32xf32>
    %36 = math.tanh %35 : vector<2x32xf32>
    %37 = arith.subf %11, %36 : vector<2x32xf32>
    %38 = arith.mulf %29, %37 : vector<2x32xf32>
    %39 = arith.addf %36, %38 : vector<2x32xf32>
    %c0_15 = arith.constant 0 : index
    %c0_16 = arith.constant 0 : index
    %c0_17 = arith.constant 0 : index
    %40 = vector.load %arg6[%c0_15, %c0_16, %c0_17] : memref<8x2x32xf32, #tpu.memory_space<vmem>>, vector<1x2x32xf32>
    %41 = vector.shape_cast %40 : vector<1x2x32xf32> to vector<2x32xf32>
    %42 = vector.shape_cast %39 : vector<2x32xf32> to vector<1x2x32xf32>
    tpu.vector_store %arg6[%c0_15, %c0_16, %c0_17], %42 {strides = array<i32>} : memref<8x2x32xf32, #tpu.memory_space<vmem>>, vector<1x2x32xf32>,
    %43 = vector.extract_strided_slice %8 {offsets = [2, 0], sizes = [2, 96], strides = [1, 1]} : vector<16x96xf32> to vector<2x96xf32>
    %cst_18 = arith.constant dense<0.000000e+00> : vector<2x96xf32>
    %44 = tpu.matmul %39, %9, %cst_18 {dimension_numbers = #tpu.dot_dimension_numbers<[1], [0], [0], [1], [0, 0, 1, 1], [], []>} : vector<2x32xf32>, vector<32x96xf32>, vector<2x96xf32> -> vector<2x96xf32>
    %45 = vector.extract_strided_slice %43 {offsets = [0, 0], sizes = [2, 32], strides = [1, 1]} : vector<2x96xf32> to vector<2x32xf32>
    %46 = vector.extract_strided_slice %44 {offsets = [0, 0], sizes = [2, 32], strides = [1, 1]} : vector<2x96xf32> to vector<2x32xf32>
    %47 = arith.addf %45, %46 : vector<2x32xf32>
    %48 = arith.negf %47 : vector<2x32xf32>
    %49 = math.exp %48 : vector<2x32xf32>
    %cst_19 = arith.constant 1.000000e+00 : f32
    %50 = vector.broadcast %cst_19 : f32 to vector<2x32xf32>
    %51 = arith.addf %50, %49 : vector<2x32xf32>
    %52 = arith.divf %50, %51 : vector<2x32xf32>
    %53 = vector.extract_strided_slice %43 {offsets = [0, 32], sizes = [2, 32], strides = [1, 1]} : vector<2x96xf32> to vector<2x32xf32>
    %54 = vector.extract_strided_slice %44 {offsets = [0, 32], sizes = [2, 32], strides = [1, 1]} : vector<2x96xf32> to vector<2x32xf32>
    %55 = arith.addf %53, %54 : vector<2x32xf32>
    %56 = arith.negf %55 : vector<2x32xf32>
    %57 = math.exp %56 : vector<2x32xf32>
    %cst_20 = arith.constant 1.000000e+00 : f32
    %58 = vector.broadcast %cst_20 : f32 to vector<2x32xf32>
    %59 = arith.addf %58, %57 : vector<2x32xf32>
    %60 = arith.divf %58, %59 : vector<2x32xf32>
    %61 = vector.extract_strided_slice %43 {offsets = [0, 64], sizes = [2, 32], strides = [1, 1]} : vector<2x96xf32> to vector<2x32xf32>
    %62 = vector.extract_strided_slice %44 {offsets = [0, 64], sizes = [2, 32], strides = [1, 1]} : vector<2x96xf32> to vector<2x32xf32>
    %63 = vector.broadcast %10 : vector<1x32xf32> to vector<2x32xf32>
    %64 = arith.addf %62, %63 : vector<2x32xf32>
    %65 = arith.mulf %52, %64 : vector<2x32xf32>
    %66 = arith.addf %61, %65 : vector<2x32xf32>
    %67 = math.tanh %66 : vector<2x32xf32>
    %68 = arith.subf %39, %67 : vector<2x32xf32>
    %69 = arith.mulf %60, %68 : vector<2x32xf32>
    %70 = arith.addf %67, %69 : vector<2x32xf32>
    %c1 = arith.constant 1 : index
    %c0_21 = arith.constant 0 : index
    %c0_22 = arith.constant 0 : index
    %71 = vector.load %arg6[%c1, %c0_21, %c0_22] : memref<8x2x32xf32, #tpu.memory_space<vmem>>, vector<1x2x32xf32>
    %72 = vector.shape_cast %71 : vector<1x2x32xf32> to vector<2x32xf32>
    %73 = vector.shape_cast %70 : vector<2x32xf32> to vector<1x2x32xf32>
    tpu.vector_store %arg6[%c1, %c0_21, %c0_22], %73 {strides = array<i32>} : memref<8x2x32xf32, #tpu.memory_space<vmem>>, vector<1x2x32xf32>,
    %74 = vector.extract_strided_slice %8 {offsets = [4, 0], sizes = [2, 96], strides = [1, 1]} : vector<16x96xf32> to vector<2x96xf32>
    %cst_23 = arith.constant dense<0.000000e+00> : vector<2x96xf32>
    %75 = tpu.matmul %70, %9, %cst_23 {dimension_numbers = #tpu.dot_dimension_numbers<[1], [0], [0], [1], [0, 0, 1, 1], [], []>} : vector<2x32xf32>, vector<32x96xf32>, vector<2x96xf32> -> vector<2x96xf32>
    %76 = vector.extract_strided_slice %74 {offsets = [0, 0], sizes = [2, 32], strides = [1, 1]} : vector<2x96xf32> to vector<2x32xf32>
    %77 = vector.extract_strided_slice %75 {offsets = [0, 0], sizes = [2, 32], strides = [1, 1]} : vector<2x96xf32> to vector<2x32xf32>
    %78 = arith.addf %76, %77 : vector<2x32xf32>
    %79 = arith.negf %78 : vector<2x32xf32>
    %80 = math.exp %79 : vector<2x32xf32>
    %cst_24 = arith.constant 1.000000e+00 : f32
    %81 = vector.broadcast %cst_24 : f32 to vector<2x32xf32>
    %82 = arith.addf %81, %80 : vector<2x32xf32>
    %83 = arith.divf %81, %82 : vector<2x32xf32>
    %84 = vector.extract_strided_slice %74 {offsets = [0, 32], sizes = [2, 32], strides = [1, 1]} : vector<2x96xf32> to vector<2x32xf32>
    %85 = vector.extract_strided_slice %75 {offsets = [0, 32], sizes = [2, 32], strides = [1, 1]} : vector<2x96xf32> to vector<2x32xf32>
    %86 = arith.addf %84, %85 : vector<2x32xf32>
    %87 = arith.negf %86 : vector<2x32xf32>
    %88 = math.exp %87 : vector<2x32xf32>
    %cst_25 = arith.constant 1.000000e+00 : f32
    %89 = vector.broadcast %cst_25 : f32 to vector<2x32xf32>
    %90 = arith.addf %89, %88 : vector<2x32xf32>
    %91 = arith.divf %89, %90 : vector<2x32xf32>
    %92 = vector.extract_strided_slice %74 {offsets = [0, 64], sizes = [2, 32], strides = [1, 1]} : vector<2x96xf32> to vector<2x32xf32>
    %93 = vector.extract_strided_slice %75 {offsets = [0, 64], sizes = [2, 32], strides = [1, 1]} : vector<2x96xf32> to vector<2x32xf32>
    %94 = vector.broadcast %10 : vector<1x32xf32> to vector<2x32xf32>
    %95 = arith.addf %93, %94 : vector<2x32xf32>
    %96 = arith.mulf %83, %95 : vector<2x32xf32>
    %97 = arith.addf %92, %96 : vector<2x32xf32>
    %98 = math.tanh %97 : vector<2x32xf32>
    %99 = arith.subf %70, %98 : vector<2x32xf32>
    %100 = arith.mulf %91, %99 : vector<2x32xf32>
    %101 = arith.addf %98, %100 : vector<2x32xf32>
    %c2 = arith.constant 2 : index
    %c0_26 = arith.constant 0 : index
    %c0_27 = arith.constant 0 : index
    %102 = vector.load %arg6[%c2, %c0_26, %c0_27] : memref<8x2x32xf32, #tpu.memory_space<vmem>>, vector<1x2x32xf32>
    %103 = vector.shape_cast %102 : vector<1x2x32xf32> to vector<2x32xf32>
    %104 = vector.shape_cast %101 : vector<2x32xf32> to vector<1x2x32xf32>
    tpu.vector_store %arg6[%c2, %c0_26, %c0_27], %104 {strides = array<i32>} : memref<8x2x32xf32, #tpu.memory_space<vmem>>, vector<1x2x32xf32>,
    %105 = vector.extract_strided_slice %8 {offsets = [6, 0], sizes = [2, 96], strides = [1, 1]} : vector<16x96xf32> to vector<2x96xf32>
    %cst_28 = arith.constant dense<0.000000e+00> : vector<2x96xf32>
    %106 = tpu.matmul %101, %9, %cst_28 {dimension_numbers = #tpu.dot_dimension_numbers<[1], [0], [0], [1], [0, 0, 1, 1], [], []>} : vector<2x32xf32>, vector<32x96xf32>, vector<2x96xf32> -> vector<2x96xf32>
    %107 = vector.extract_strided_slice %105 {offsets = [0, 0], sizes = [2, 32], strides = [1, 1]} : vector<2x96xf32> to vector<2x32xf32>
    %108 = vector.extract_strided_slice %106 {offsets = [0, 0], sizes = [2, 32], strides = [1, 1]} : vector<2x96xf32> to vector<2x32xf32>
    %109 = arith.addf %107, %108 : vector<2x32xf32>
    %110 = arith.negf %109 : vector<2x32xf32>
    %111 = math.exp %110 : vector<2x32xf32>
    %cst_29 = arith.constant 1.000000e+00 : f32
    %112 = vector.broadcast %cst_29 : f32 to vector<2x32xf32>
    %113 = arith.addf %112, %111 : vector<2x32xf32>
    %114 = arith.divf %112, %113 : vector<2x32xf32>
    %115 = vector.extract_strided_slice %105 {offsets = [0, 32], sizes = [2, 32], strides = [1, 1]} : vector<2x96xf32> to vector<2x32xf32>
    %116 = vector.extract_strided_slice %106 {offsets = [0, 32], sizes = [2, 32], strides = [1, 1]} : vector<2x96xf32> to vector<2x32xf32>
    %117 = arith.addf %115, %116 : vector<2x32xf32>
    %118 = arith.negf %117 : vector<2x32xf32>
    %119 = math.exp %118 : vector<2x32xf32>
    %cst_30 = arith.constant 1.000000e+00 : f32
    %120 = vector.broadcast %cst_30 : f32 to vector<2x32xf32>
    %121 = arith.addf %120, %119 : vector<2x32xf32>
    %122 = arith.divf %120, %121 : vector<2x32xf32>
    %123 = vector.extract_strided_slice %105 {offsets = [0, 64], sizes = [2, 32], strides = [1, 1]} : vector<2x96xf32> to vector<2x32xf32>
    %124 = vector.extract_strided_slice %106 {offsets = [0, 64], sizes = [2, 32], strides = [1, 1]} : vector<2x96xf32> to vector<2x32xf32>
    %125 = vector.broadcast %10 : vector<1x32xf32> to vector<2x32xf32>
    %126 = arith.addf %124, %125 : vector<2x32xf32>
    %127 = arith.mulf %114, %126 : vector<2x32xf32>
    %128 = arith.addf %123, %127 : vector<2x32xf32>
    %129 = math.tanh %128 : vector<2x32xf32>
    %130 = arith.subf %101, %129 : vector<2x32xf32>
    %131 = arith.mulf %122, %130 : vector<2x32xf32>
    %132 = arith.addf %129, %131 : vector<2x32xf32>
    %c3 = arith.constant 3 : index
    %c0_31 = arith.constant 0 : index
    %c0_32 = arith.constant 0 : index
    %133 = vector.load %arg6[%c3, %c0_31, %c0_32] : memref<8x2x32xf32, #tpu.memory_space<vmem>>, vector<1x2x32xf32>
    %134 = vector.shape_cast %133 : vector<1x2x32xf32> to vector<2x32xf32>
    %135 = vector.shape_cast %132 : vector<2x32xf32> to vector<1x2x32xf32>
    tpu.vector_store %arg6[%c3, %c0_31, %c0_32], %135 {strides = array<i32>} : memref<8x2x32xf32, #tpu.memory_space<vmem>>, vector<1x2x32xf32>,
    %136 = vector.extract_strided_slice %8 {offsets = [8, 0], sizes = [2, 96], strides = [1, 1]} : vector<16x96xf32> to vector<2x96xf32>
    %cst_33 = arith.constant dense<0.000000e+00> : vector<2x96xf32>
    %137 = tpu.matmul %132, %9, %cst_33 {dimension_numbers = #tpu.dot_dimension_numbers<[1], [0], [0], [1], [0, 0, 1, 1], [], []>} : vector<2x32xf32>, vector<32x96xf32>, vector<2x96xf32> -> vector<2x96xf32>
    %138 = vector.extract_strided_slice %136 {offsets = [0, 0], sizes = [2, 32], strides = [1, 1]} : vector<2x96xf32> to vector<2x32xf32>
    %139 = vector.extract_strided_slice %137 {offsets = [0, 0], sizes = [2, 32], strides = [1, 1]} : vector<2x96xf32> to vector<2x32xf32>
    %140 = arith.addf %138, %139 : vector<2x32xf32>
    %141 = arith.negf %140 : vector<2x32xf32>
    %142 = math.exp %141 : vector<2x32xf32>
    %cst_34 = arith.constant 1.000000e+00 : f32
    %143 = vector.broadcast %cst_34 : f32 to vector<2x32xf32>
    %144 = arith.addf %143, %142 : vector<2x32xf32>
    %145 = arith.divf %143, %144 : vector<2x32xf32>
    %146 = vector.extract_strided_slice %136 {offsets = [0, 32], sizes = [2, 32], strides = [1, 1]} : vector<2x96xf32> to vector<2x32xf32>
    %147 = vector.extract_strided_slice %137 {offsets = [0, 32], sizes = [2, 32], strides = [1, 1]} : vector<2x96xf32> to vector<2x32xf32>
    %148 = arith.addf %146, %147 : vector<2x32xf32>
    %149 = arith.negf %148 : vector<2x32xf32>
    %150 = math.exp %149 : vector<2x32xf32>
    %cst_35 = arith.constant 1.000000e+00 : f32
    %151 = vector.broadcast %cst_35 : f32 to vector<2x32xf32>
    %152 = arith.addf %151, %150 : vector<2x32xf32>
    %153 = arith.divf %151, %152 : vector<2x32xf32>
    %154 = vector.extract_strided_slice %136 {offsets = [0, 64], sizes = [2, 32], strides = [1, 1]} : vector<2x96xf32> to vector<2x32xf32>
    %155 = vector.extract_strided_slice %137 {offsets = [0, 64], sizes = [2, 32], strides = [1, 1]} : vector<2x96xf32> to vector<2x32xf32>
    %156 = vector.broadcast %10 : vector<1x32xf32> to vector<2x32xf32>
    %157 = arith.addf %155, %156 : vector<2x32xf32>
    %158 = arith.mulf %145, %157 : vector<2x32xf32>
    %159 = arith.addf %154, %158 : vector<2x32xf32>
    %160 = math.tanh %159 : vector<2x32xf32>
    %161 = arith.subf %132, %160 : vector<2x32xf32>
    %162 = arith.mulf %153, %161 : vector<2x32xf32>
    %163 = arith.addf %160, %162 : vector<2x32xf32>
    %c4 = arith.constant 4 : index
    %c0_36 = arith.constant 0 : index
    %c0_37 = arith.constant 0 : index
    %164 = vector.load %arg6[%c4, %c0_36, %c0_37] : memref<8x2x32xf32, #tpu.memory_space<vmem>>, vector<1x2x32xf32>
    %165 = vector.shape_cast %164 : vector<1x2x32xf32> to vector<2x32xf32>
    %166 = vector.shape_cast %163 : vector<2x32xf32> to vector<1x2x32xf32>
    tpu.vector_store %arg6[%c4, %c0_36, %c0_37], %166 {strides = array<i32>} : memref<8x2x32xf32, #tpu.memory_space<vmem>>, vector<1x2x32xf32>,
    %167 = vector.extract_strided_slice %8 {offsets = [10, 0], sizes = [2, 96], strides = [1, 1]} : vector<16x96xf32> to vector<2x96xf32>
    %cst_38 = arith.constant dense<0.000000e+00> : vector<2x96xf32>
    %168 = tpu.matmul %163, %9, %cst_38 {dimension_numbers = #tpu.dot_dimension_numbers<[1], [0], [0], [1], [0, 0, 1, 1], [], []>} : vector<2x32xf32>, vector<32x96xf32>, vector<2x96xf32> -> vector<2x96xf32>
    %169 = vector.extract_strided_slice %167 {offsets = [0, 0], sizes = [2, 32], strides = [1, 1]} : vector<2x96xf32> to vector<2x32xf32>
    %170 = vector.extract_strided_slice %168 {offsets = [0, 0], sizes = [2, 32], strides = [1, 1]} : vector<2x96xf32> to vector<2x32xf32>
    %171 = arith.addf %169, %170 : vector<2x32xf32>
    %172 = arith.negf %171 : vector<2x32xf32>
    %173 = math.exp %172 : vector<2x32xf32>
    %cst_39 = arith.constant 1.000000e+00 : f32
    %174 = vector.broadcast %cst_39 : f32 to vector<2x32xf32>
    %175 = arith.addf %174, %173 : vector<2x32xf32>
    %176 = arith.divf %174, %175 : vector<2x32xf32>
    %177 = vector.extract_strided_slice %167 {offsets = [0, 32], sizes = [2, 32], strides = [1, 1]} : vector<2x96xf32> to vector<2x32xf32>
    %178 = vector.extract_strided_slice %168 {offsets = [0, 32], sizes = [2, 32], strides = [1, 1]} : vector<2x96xf32> to vector<2x32xf32>
    %179 = arith.addf %177, %178 : vector<2x32xf32>
    %180 = arith.negf %179 : vector<2x32xf32>
    %181 = math.exp %180 : vector<2x32xf32>
    %cst_40 = arith.constant 1.000000e+00 : f32
    %182 = vector.broadcast %cst_40 : f32 to vector<2x32xf32>
    %183 = arith.addf %182, %181 : vector<2x32xf32>
    %184 = arith.divf %182, %183 : vector<2x32xf32>
    %185 = vector.extract_strided_slice %167 {offsets = [0, 64], sizes = [2, 32], strides = [1, 1]} : vector<2x96xf32> to vector<2x32xf32>
    %186 = vector.extract_strided_slice %168 {offsets = [0, 64], sizes = [2, 32], strides = [1, 1]} : vector<2x96xf32> to vector<2x32xf32>
    %187 = vector.broadcast %10 : vector<1x32xf32> to vector<2x32xf32>
    %188 = arith.addf %186, %187 : vector<2x32xf32>
    %189 = arith.mulf %176, %188 : vector<2x32xf32>
    %190 = arith.addf %185, %189 : vector<2x32xf32>
    %191 = math.tanh %190 : vector<2x32xf32>
    %192 = arith.subf %163, %191 : vector<2x32xf32>
    %193 = arith.mulf %184, %192 : vector<2x32xf32>
    %194 = arith.addf %191, %193 : vector<2x32xf32>
    %c5 = arith.constant 5 : index
    %c0_41 = arith.constant 0 : index
    %c0_42 = arith.constant 0 : index
    %195 = vector.load %arg6[%c5, %c0_41, %c0_42] : memref<8x2x32xf32, #tpu.memory_space<vmem>>, vector<1x2x32xf32>
    %196 = vector.shape_cast %195 : vector<1x2x32xf32> to vector<2x32xf32>
    %197 = vector.shape_cast %194 : vector<2x32xf32> to vector<1x2x32xf32>
    tpu.vector_store %arg6[%c5, %c0_41, %c0_42], %197 {strides = array<i32>} : memref<8x2x32xf32, #tpu.memory_space<vmem>>, vector<1x2x32xf32>,
    %198 = vector.extract_strided_slice %8 {offsets = [12, 0], sizes = [2, 96], strides = [1, 1]} : vector<16x96xf32> to vector<2x96xf32>
    %cst_43 = arith.constant dense<0.000000e+00> : vector<2x96xf32>
    %199 = tpu.matmul %194, %9, %cst_43 {dimension_numbers = #tpu.dot_dimension_numbers<[1], [0], [0], [1], [0, 0, 1, 1], [], []>} : vector<2x32xf32>, vector<32x96xf32>, vector<2x96xf32> -> vector<2x96xf32>
    %200 = vector.extract_strided_slice %198 {offsets = [0, 0], sizes = [2, 32], strides = [1, 1]} : vector<2x96xf32> to vector<2x32xf32>
    %201 = vector.extract_strided_slice %199 {offsets = [0, 0], sizes = [2, 32], strides = [1, 1]} : vector<2x96xf32> to vector<2x32xf32>
    %202 = arith.addf %200, %201 : vector<2x32xf32>
    %203 = arith.negf %202 : vector<2x32xf32>
    %204 = math.exp %203 : vector<2x32xf32>
    %cst_44 = arith.constant 1.000000e+00 : f32
    %205 = vector.broadcast %cst_44 : f32 to vector<2x32xf32>
    %206 = arith.addf %205, %204 : vector<2x32xf32>
    %207 = arith.divf %205, %206 : vector<2x32xf32>
    %208 = vector.extract_strided_slice %198 {offsets = [0, 32], sizes = [2, 32], strides = [1, 1]} : vector<2x96xf32> to vector<2x32xf32>
    %209 = vector.extract_strided_slice %199 {offsets = [0, 32], sizes = [2, 32], strides = [1, 1]} : vector<2x96xf32> to vector<2x32xf32>
    %210 = arith.addf %208, %209 : vector<2x32xf32>
    %211 = arith.negf %210 : vector<2x32xf32>
    %212 = math.exp %211 : vector<2x32xf32>
    %cst_45 = arith.constant 1.000000e+00 : f32
    %213 = vector.broadcast %cst_45 : f32 to vector<2x32xf32>
    %214 = arith.addf %213, %212 : vector<2x32xf32>
    %215 = arith.divf %213, %214 : vector<2x32xf32>
    %216 = vector.extract_strided_slice %198 {offsets = [0, 64], sizes = [2, 32], strides = [1, 1]} : vector<2x96xf32> to vector<2x32xf32>
    %217 = vector.extract_strided_slice %199 {offsets = [0, 64], sizes = [2, 32], strides = [1, 1]} : vector<2x96xf32> to vector<2x32xf32>
    %218 = vector.broadcast %10 : vector<1x32xf32> to vector<2x32xf32>
    %219 = arith.addf %217, %218 : vector<2x32xf32>
    %220 = arith.mulf %207, %219 : vector<2x32xf32>
    %221 = arith.addf %216, %220 : vector<2x32xf32>
    %222 = math.tanh %221 : vector<2x32xf32>
    %223 = arith.subf %194, %222 : vector<2x32xf32>
    %224 = arith.mulf %215, %223 : vector<2x32xf32>
    %225 = arith.addf %222, %224 : vector<2x32xf32>
    %c6 = arith.constant 6 : index
    %c0_46 = arith.constant 0 : index
    %c0_47 = arith.constant 0 : index
    %226 = vector.load %arg6[%c6, %c0_46, %c0_47] : memref<8x2x32xf32, #tpu.memory_space<vmem>>, vector<1x2x32xf32>
    %227 = vector.shape_cast %226 : vector<1x2x32xf32> to vector<2x32xf32>
    %228 = vector.shape_cast %225 : vector<2x32xf32> to vector<1x2x32xf32>
    tpu.vector_store %arg6[%c6, %c0_46, %c0_47], %228 {strides = array<i32>} : memref<8x2x32xf32, #tpu.memory_space<vmem>>, vector<1x2x32xf32>,
    %229 = vector.extract_strided_slice %8 {offsets = [14, 0], sizes = [2, 96], strides = [1, 1]} : vector<16x96xf32> to vector<2x96xf32>
    %cst_48 = arith.constant dense<0.000000e+00> : vector<2x96xf32>
    %230 = tpu.matmul %225, %9, %cst_48 {dimension_numbers = #tpu.dot_dimension_numbers<[1], [0], [0], [1], [0, 0, 1, 1], [], []>} : vector<2x32xf32>, vector<32x96xf32>, vector<2x96xf32> -> vector<2x96xf32>
    %231 = vector.extract_strided_slice %229 {offsets = [0, 0], sizes = [2, 32], strides = [1, 1]} : vector<2x96xf32> to vector<2x32xf32>
    %232 = vector.extract_strided_slice %230 {offsets = [0, 0], sizes = [2, 32], strides = [1, 1]} : vector<2x96xf32> to vector<2x32xf32>
    %233 = arith.addf %231, %232 : vector<2x32xf32>
    %234 = arith.negf %233 : vector<2x32xf32>
    %235 = math.exp %234 : vector<2x32xf32>
    %cst_49 = arith.constant 1.000000e+00 : f32
    %236 = vector.broadcast %cst_49 : f32 to vector<2x32xf32>
    %237 = arith.addf %236, %235 : vector<2x32xf32>
    %238 = arith.divf %236, %237 : vector<2x32xf32>
    %239 = vector.extract_strided_slice %229 {offsets = [0, 32], sizes = [2, 32], strides = [1, 1]} : vector<2x96xf32> to vector<2x32xf32>
    %240 = vector.extract_strided_slice %230 {offsets = [0, 32], sizes = [2, 32], strides = [1, 1]} : vector<2x96xf32> to vector<2x32xf32>
    %241 = arith.addf %239, %240 : vector<2x32xf32>
    %242 = arith.negf %241 : vector<2x32xf32>
    %243 = math.exp %242 : vector<2x32xf32>
    %cst_50 = arith.constant 1.000000e+00 : f32
    %244 = vector.broadcast %cst_50 : f32 to vector<2x32xf32>
    %245 = arith.addf %244, %243 : vector<2x32xf32>
    %246 = arith.divf %244, %245 : vector<2x32xf32>
    %247 = vector.extract_strided_slice %229 {offsets = [0, 64], sizes = [2, 32], strides = [1, 1]} : vector<2x96xf32> to vector<2x32xf32>
    %248 = vector.extract_strided_slice %230 {offsets = [0, 64], sizes = [2, 32], strides = [1, 1]} : vector<2x96xf32> to vector<2x32xf32>
    %249 = vector.broadcast %10 : vector<1x32xf32> to vector<2x32xf32>
    %250 = arith.addf %248, %249 : vector<2x32xf32>
    %251 = arith.mulf %238, %250 : vector<2x32xf32>
    %252 = arith.addf %247, %251 : vector<2x32xf32>
    %253 = math.tanh %252 : vector<2x32xf32>
    %254 = arith.subf %225, %253 : vector<2x32xf32>
    %255 = arith.mulf %246, %254 : vector<2x32xf32>
    %256 = arith.addf %253, %255 : vector<2x32xf32>
    %c7 = arith.constant 7 : index
    %c0_51 = arith.constant 0 : index
    %c0_52 = arith.constant 0 : index
    %257 = vector.load %arg6[%c7, %c0_51, %c0_52] : memref<8x2x32xf32, #tpu.memory_space<vmem>>, vector<1x2x32xf32>
    %258 = vector.shape_cast %257 : vector<1x2x32xf32> to vector<2x32xf32>
    %259 = vector.shape_cast %256 : vector<2x32xf32> to vector<1x2x32xf32>
    tpu.vector_store %arg6[%c7, %c0_51, %c0_52], %259 {strides = array<i32>} : memref<8x2x32xf32, #tpu.memory_space<vmem>>, vector<1x2x32xf32>,
    %c0_53 = arith.constant 0 : index
    %c0_54 = arith.constant 0 : index
    %260 = vector.load %arg7[%c0_53, %c0_54] : memref<2x32xf32, #tpu.memory_space<vmem>>, vector<2x32xf32>
    tpu.vector_store %arg7[%c0_53, %c0_54], %256 {strides = array<i32>} : memref<2x32xf32, #tpu.memory_space<vmem>>, vector<2x32xf32>,
    return
  }
  func.func @transform_0(%arg0: i32) -> (i32, i32) {
    %c0_i32 = arith.constant 0 : i32
    %c0_i32_0 = arith.constant 0 : i32
    return %arg0, %c0_i32 : i32, i32
  }
  func.func @transform_1(%arg0: i32) -> (i32, i32) {
    %c0_i32 = arith.constant 0 : i32
    %c0_i32_0 = arith.constant 0 : i32
    %c0_i32_1 = arith.constant 0 : i32
    return %c0_i32, %c0_i32_0 : i32, i32
  }
  func.func @transform_2(%arg0: i32) -> (i32, i32) {
    %c0_i32 = arith.constant 0 : i32
    %c0_i32_0 = arith.constant 0 : i32
    %c0_i32_1 = arith.constant 0 : i32
    return %c0_i32, %c0_i32_0 : i32, i32
  }
  func.func @transform_3(%arg0: i32) -> (i32, i32) {
    %c0_i32 = arith.constant 0 : i32
    %c0_i32_0 = arith.constant 0 : i32
    %c0_i32_1 = arith.constant 0 : i32
    return %c0_i32, %c0_i32_0 : i32, i32
  }
  func.func @transform_4(%arg0: i32) -> (i32, i32) {
    %c0_i32 = arith.constant 0 : i32
    %c0_i32_0 = arith.constant 0 : i32
    %c0_i32_1 = arith.constant 0 : i32
    return %c0_i32, %c0_i32_0 : i32, i32
  }
  func.func @transform_5(%arg0: i32) -> (i32, i32, i32) {
    %c0_i32 = arith.constant 0 : i32
    %c0_i32_0 = arith.constant 0 : i32
    %c0_i32_1 = arith.constant 0 : i32
    return %arg0, %c0_i32, %c0_i32_0 : i32, i32, i32
  }
}

module attributes {stable_mosaic.version = 11 : i64} {
  func.func @head_kernel(%arg0: i32, %arg1: memref<16x32xf32, #tpu.memory_space<vmem>>, %arg2: memref<32x8xf32, #tpu.memory_space<vmem>>, %arg3: memref<1x8xf32, #tpu.memory_space<vmem>>, %arg4: memref<16x8xf32, #tpu.memory_space<vmem>>) attributes {dimension_semantics = [#tpu.dimension_semantics<parallel>], iteration_bounds = array<i64: 1>, scalar_prefetch = 0 : i64, scratch_operands = 0 : i64, tpu.core_type = #tpu.core_type<tc>, window_params = [{transform_indices = @transform_0, window_bounds = array<i64: 16, 32>}, {pipeline_mode = #tpu.pipeline_mode<synchronous>, transform_indices = @transform_1, window_bounds = array<i64: 32, 8>}, {pipeline_mode = #tpu.pipeline_mode<synchronous>, transform_indices = @transform_2, window_bounds = array<i64: 1, 8>}, {transform_indices = @transform_3, window_bounds = array<i64: 16, 8>}]} {
    %c0 = arith.constant 0 : index
    %c0_0 = arith.constant 0 : index
    %0 = vector.load %arg1[%c0, %c0_0] : memref<16x32xf32, #tpu.memory_space<vmem>>, vector<16x32xf32>
    %c0_1 = arith.constant 0 : index
    %c0_2 = arith.constant 0 : index
    %1 = vector.load %arg2[%c0_1, %c0_2] : memref<32x8xf32, #tpu.memory_space<vmem>>, vector<32x8xf32>
    %cst = arith.constant dense<0.000000e+00> : vector<16x8xf32>
    %2 = tpu.matmul %0, %1, %cst {dimension_numbers = #tpu.dot_dimension_numbers<[1], [0], [0], [1], [0, 0, 1, 1], [], []>} : vector<16x32xf32>, vector<32x8xf32>, vector<16x8xf32> -> vector<16x8xf32>
    %c0_3 = arith.constant 0 : index
    %c0_4 = arith.constant 0 : index
    %3 = vector.load %arg3[%c0_3, %c0_4] : memref<1x8xf32, #tpu.memory_space<vmem>>, vector<1x8xf32>
    %4 = vector.broadcast %3 : vector<1x8xf32> to vector<16x8xf32>
    %5 = arith.addf %2, %4 : vector<16x8xf32>
    %cst_5 = arith.constant dense<0xFF800000> : vector<16xf32>
    %6 = vector.multi_reduction <maximumf>, %5, %cst_5 [1] : vector<16x8xf32> to vector<16xf32>
    %7 = vector.shape_cast %6 : vector<16xf32> to vector<16x1xf32>
    %8 = vector.broadcast %7 : vector<16x1xf32> to vector<16x8xf32>
    %9 = arith.subf %5, %8 : vector<16x8xf32>
    %10 = math.exp %9 : vector<16x8xf32>
    %cst_6 = arith.constant dense<0.000000e+00> : vector<16xf32>
    %11 = vector.multi_reduction <add>, %10, %cst_6 [1] : vector<16x8xf32> to vector<16xf32>
    %12 = vector.shape_cast %11 : vector<16xf32> to vector<16x1xf32>
    %13 = math.log %12 : vector<16x1xf32>
    %14 = vector.broadcast %13 : vector<16x1xf32> to vector<16x8xf32>
    %15 = arith.subf %9, %14 : vector<16x8xf32>
    %c0_7 = arith.constant 0 : index
    %c0_8 = arith.constant 0 : index
    %16 = vector.load %arg4[%c0_7, %c0_8] : memref<16x8xf32, #tpu.memory_space<vmem>>, vector<16x8xf32>
    tpu.vector_store %arg4[%c0_7, %c0_8], %15 {strides = array<i32>} : memref<16x8xf32, #tpu.memory_space<vmem>>, vector<16x8xf32>,
    return
  }
  func.func @transform_0(%arg0: i32) -> (i32, i32) {
    %c0_i32 = arith.constant 0 : i32
    %c0_i32_0 = arith.constant 0 : i32
    return %arg0, %c0_i32 : i32, i32
  }
  func.func @transform_1(%arg0: i32) -> (i32, i32) {
    %c0_i32 = arith.constant 0 : i32
    %c0_i32_0 = arith.constant 0 : i32
    %c0_i32_1 = arith.constant 0 : i32
    return %c0_i32, %c0_i32_0 : i32, i32
  }
  func.func @transform_2(%arg0: i32) -> (i32, i32) {
    %c0_i32 = arith.constant 0 : i32
    %c0_i32_0 = arith.constant 0 : i32
    %c0_i32_1 = arith.constant 0 : i32
    return %c0_i32, %c0_i32_0 : i32, i32
  }
  func.func @transform_3(%arg0: i32) -> (i32, i32) {
    %c0_i32 = arith.constant 0 : i32
    %c0_i32_0 = arith.constant 0 : i32
    return %arg0, %c0_i32 : i32, i32
  }
}

</mosaic_0001>

<bundles_post_ra>
// kernel: classifier_forward.5
= control target key start
LH: loop header
LB: loop body
LE: loop exit
PB: predicated region body
PF: predicated region fallthrough
CT: control target
= control target key end

     0   :  { %vm24_vm0 = vcmask 261120   ;;  %vm54_vm1 = vcmask 64512   ;;  %s153_s1 = inlined_call_operand.vmem [shape: f32[32,8], index: 1, kind: input, shape index: {}]   ;;  %s154_s2 = inlined_call_operand.vmem [shape: f32[1,8], index: 2, kind: input, shape index: {}]   ;;  %s155_s0 = inlined_call_operand.vmem [shape: f32[16,32], index: 0, kind: input, shape index: {}]   ;;  %s156_s3 = inlined_call_operand.vmem [shape: f32[16,8], index: 3, kind: output, shape index: {}]  }
   0x1   :  { %v19_v0 = vld [vmem:[%s153_s1 + $0x18] sm:$0xff]  ;;  %v18_v1 = vld [vmem:[%s153_s1 + $0x10] sm:$0xff]  ;;  %v17_v2 = vld [vmem:[%s153_s1 + $0x8] sm:$0xff] }
   0x2   :  { %43 = vmatpush.msra.mxu0 %v19_v0  ;;  %87 = vmatpush.msra.mxu1 %v19_v0  ;;  %v16_v3 = vld [vmem:[%s153_s1] sm:$0xff]  ;;  %v15_v5 = vld [vmem:[%s155_s0 + $0x8] sm:$0xff] }
   0x3   :  { %v14_v4 = vld [vmem:[%s155_s0] sm:$0xff] }
   0x4   :  { %44 = vmatpush.msra.mxu0 %v18_v1  ;;  %88 = vmatpush.msra.mxu1 %v18_v1  ;;  %v91_v6 = vld [vmem:[%s154_s2] ss:$0 sm:$0xff] }
   0x6   :  { %45 = vmatpush.msra.mxu0 %v17_v2  ;;  %89 = vmatpush.msra.mxu1 %v17_v2 }
   0x8   :  { %46 = vmatpush.msra.mxu0 %v16_v3  ;;  %90 = vmatpush.msra.mxu1 %v16_v3 }
   0x9   :  { %85 = vmatmul.msk.f32.vlgmr.msra.gmra.mxu0 %vm24_vm0, %v14_v4  ;;  %86 = vmatmul.msk.f32.vlgmr.msra.gmra.mxu1 %vm24_vm0, %v15_v5 }
  0x86   :  { %v48_v7 = vpop.f32.mrf.mxu0  ;;  %v51_v9 = vpop.f32.mrf.mxu1 }
  0x87   :  { %v49_v8 = vadd.f32 %v91_v6, %v48_v7  ;;  %v52_v11 = vadd.f32 %v91_v6, %v51_v9 }
  0x89   :  { %v55_v10 = vsel %vm54_vm1, %v49_v8, -inf  ;;  %v58_v12 = vsel %vm54_vm1, %v52_v11, -inf }
  0x8a   :  { %56 = vmax.xlane.f32.xlu0 %v55_v10 }
  0x92   :  { %59 = vmax.xlane.f32.xlu0 %v58_v12 }
  0xfd   :  { %v57_v13 = vpop.xlane.xlu0 %56 }
  0xfe   :  { %v61_v14 = vsub.f32 %v49_v8, %v57_v13 }
 0x100   :  { %v63_v15 = vmul.f32 1.442695, %v61_v14 }
 0x102   :  { %92 = vpow2.f32 %v63_v15 }
 0x105   :  { %v60_v16 = vpop.xlane.xlu0 %59 }
 0x106   :  { %v62_v17 = vsub.f32 %v52_v11, %v60_v16 }
 0x108   :  { %v93_v18 = vpop.eup %92  ;;  %v65_v19 = vmul.f32 1.442695, %v62_v17 }
 0x109   :  { %v67_v20 = vsel %vm54_vm1, %v93_v18, 0.0 }
 0x10a   :  { %94 = vpow2.f32 %v65_v19  ;;  %68 = vadd.xlane.f32.xlu1 %v67_v20 }
 0x110   :  { %v95_v21 = vpop.eup %94 }
 0x111   :  { %v70_v22 = vsel %vm54_vm1, %v95_v21, 0.0 }
 0x112   :  { %71 = vadd.xlane.f32.xlu1 %v70_v22 }
 0x17d   :  { %v69_v23 = vpop.xlane.xlu1 %68 }
 0x17e   :  { %96 = vlog2.f32 %v69_v23 }
 0x184   :  { %v97_v24 = vpop.eup %96 }
 0x185   :  { %v74_v25 = vmul.f32 0.6931472, %v97_v24  ;;  %v72_v26 = vpop.xlane.xlu1 %71 }
 0x186   :  { %98 = vlog2.f32 %v72_v26 }
 0x187   :  { %v77_v27 = vsub.f32 %v61_v14, %v74_v25 }
 0x189   :  { %79 = vst.msk [vmem:[%s156_s3] sm:$0xff] %vm54_vm1, %v77_v27 }
 0x18c   :  { %v99_v28 = vpop.eup %98 }
 0x18d   :  { %v76_v29 = vmul.f32 0.6931472, %v99_v28 }
 0x18f   :  { %v78_v30 = vsub.f32 %v62_v17, %v76_v29 }
 0x191   :  { %80 = vst.msk [vmem:[%s156_s3 + $0x8] sm:$0xff] %vm54_vm1, %v78_v30 }

// kernel: classifier_forward.3
= control target key start
LH: loop header
LB: loop body
LE: loop exit
PB: predicated region body
PF: predicated region fallthrough
CT: control target
= control target key end

     0   :  { %10 = vsyncpa [#allocation4], 0  ;;  %s849_s21 = smov [#allocation3]   ;;  %s850_s23 = smov 128   ;;  %s1055_s0 = inlined_call_operand.vmem [shape: f32[16,16], index: 0, kind: input, shape index: {}]   ;;  %s1056_s1 = inlined_call_operand.hbm [shape: f32[16,96], index: 1, kind: input, shape index: {}]   ;;  %s1057_s2 = inlined_call_operand.vmem [shape: f32[1,96], index: 2, kind: input, shape index: {}]   ;;  %s1058_s3 = inlined_call_operand.vmem [shape: f32[32,96], index: 3, kind: input, shape index: {}]   ;;  %s1059_s4 = inlined_call_operand.vmem [shape: f32[1,32], index: 4, kind: input, shape index: {}]   ;;  %s1060_s5 = inlined_call_operand.vmem [shape: f32[8,2,32], index: 5, kind: output, shape index: {}]  }
   0x1   :  { %s17_s20 = sshll.u32 %s1056_s1, 4  ;;  %s19_s22 = sshll.u32 %s849_s21, 4  ;;  %s18_s20 = int_to_ptr.hbm [resolvable:$true] %s17_s20  ;;  %s20_s22 = int_to_ptr.vmem [resolvable:$true] %s19_s22 }
   0x2   :  { %s851_s24 = smov 8  }
   0x3   :  { %25 = dma.hbm_to_vmem [thread:$0]  %s18_s20, 256, %s20_s22, [#allocation4], %s850_s23, %s850_s23, %s851_s24  }
   0x4   :  { %847 = dma.done.wait [#allocation4], 256  }
   0x5   :  { %848 = vsyncadd [#allocation4], 4294967040  ;;  %vm40_vm0 = vcmask 254976   ;;  %v852_v0 = vmov 0.0   ;;  %v83_v1 = vld [vmem:[%s1058_s3 + $0x18] sm:$0xff]  ;;  %v45_v2 = vld [vmem:[#allocation3 + $0x8] sm:$0xff] }
   0x6   :  { %41 = vst.msk [vmem:[#allocation2] sm:$0x3] %vm40_vm0, %v852_v0  ;;  %v82_v3 = vld [vmem:[%s1058_s3 + $0x10] sm:$0xff]  ;;  %102 = vmatpush.msra.mxu1 %v83_v1  ;;  %71 = vmatpush.msra.mxu0 %v45_v2  ;;  %v44_v4 = vld [vmem:[#allocation3] sm:$0xff]  ;;  %vm50_vm1 = vcmask 130048   ;;  %vm86_vm2 = vcmask 261120  }
   0x7   :  { %v42_v5 = vld [vmem:[%s1055_s0] sm:$0xff]  ;;  %v81_v6 = vld [vmem:[%s1058_s3 + $0x8] sm:$0xff]  ;;  %182 = vmatpush.msra.mxu2 %v83_v1  ;;  %265 = vmatpush.msra.mxu3 %v83_v1  ;;  %s853_s11 = smov 64   ;;  %s855_s14 = smov 96  }
   0x8   :  { %103 = vmatpush.msra.mxu1 %v82_v3  ;;  %72 = vmatpush.msra.mxu0 %v44_v4  ;;  %v773_v7 = vld [vmem:[%s1059_s4] ss:$0 sm:$0xff] }
   0x9   :  { %741 = vmatmul.msk.f32.vlgmr.msra.gmra.mxu0 %vm50_vm1, %v42_v5  ;;  %v80_v8 = vld [vmem:[%s1058_s3] sm:$0xff]  ;;  %183 = vmatpush.msra.mxu2 %v82_v3 }
   0xa   :  { %104 = vmatpush.msra.mxu1 %v81_v6  ;;  %132 = vrot.lane.b32.xlu0 %v773_v7, %s853_s11  ;;  %v921_v13 = vld [vmem:[%s1057_s2] ss:$0 sm:$0xff]  ;;  %s854_s2 = smov 32  }
   0xb   :  { %184 = vmatpush.msra.mxu2 %v81_v6  ;;  %266 = vmatpush.msra.mxu3 %v82_v3 }
   0xc   :  { %105 = vmatpush.msra.mxu1 %v80_v8  ;;  %588 = vmatpush.msrb.mxu0 %v83_v1 }
   0xd   :  { %v909_v9 = vld [vmem:[#allocation2] sm:$0x3]  ;;  %185 = vmatpush.msra.mxu2 %v80_v8  ;;  %267 = vmatpush.msra.mxu3 %v81_v6 }
   0xe   :  { %743 = vmatmul.msk.f32.vlgmr.msra.gmra.mxu1 %vm86_vm2, %v909_v9  ;;  %589 = vmatpush.msrb.mxu0 %v82_v3 }
   0xf   :  { %348 = vmatpush.msrb.mxu1 %v83_v1  ;;  %431 = vmatpush.msrb.mxu2 %v83_v1 }
  0x10   :  { %268 = vmatpush.msra.mxu3 %v80_v8  ;;  %590 = vmatpush.msrb.mxu0 %v81_v6 }
  0x11   :  { %349 = vmatpush.msrb.mxu1 %v82_v3  ;;  %432 = vmatpush.msrb.mxu2 %v82_v3 }
  0x12   :  { %506 = vmatpush.msrb.mxu3 %v83_v1  ;;  %591 = vmatpush.msrb.mxu0 %v80_v8 }
  0x13   :  { %350 = vmatpush.msrb.mxu1 %v81_v6  ;;  %433 = vmatpush.msrb.mxu2 %v81_v6 }
  0x14   :  { %507 = vmatpush.msrb.mxu3 %v82_v3 }
  0x15   :  { %351 = vmatpush.msrb.mxu1 %v80_v8  ;;  %434 = vmatpush.msrb.mxu2 %v80_v8 }
  0x16   :  { %508 = vmatpush.msrb.mxu3 %v81_v6 }
  0x17   :  { %670 = vmatpush.msra.mxu1 %v83_v1 }
  0x18   :  { %509 = vmatpush.msrb.mxu3 %v80_v8 }
  0x19   :  { %671 = vmatpush.msra.mxu1 %v82_v3 }
  0x1b   :  { %672 = vmatpush.msra.mxu1 %v81_v6 }
  0x1d   :  { %673 = vmatpush.msra.mxu1 %v80_v8 }
  0x7c   :  { %v914_v10 = vpop.permute.xlu0 %132 }
  0x86   :  { %v74_v14 = vpop.f32.mrf.mxu0 }
  0x87   :  { %v924_v15 = vadd.f32 %v921_v13, %v74_v14 }
  0x8b   :  { %v107_v11 = vpop.f32.mrf.mxu1 }
  0x8c   :  { %v135_v12 = vadd.f32 %v914_v10, %v107_v11  ;;  %v110_v16 = vadd.f32 %v107_v11, %v924_v15 }
  0x8e   :  { %137 = vrot.lane.b32.xlu0 %v135_v12, %s853_s11  ;;  %v744_v17 = vmul.f32 -1.442695, %v110_v16 }
  0x90   :  { %775 = vpow2.f32 %v744_v17 }
  0x96   :  { %v776_v18 = vpop.eup %775 }
  0x97   :  { %v114_v19 = vadd.f32 1.0, %v776_v18 }
  0x99   :  { %777 = vrcp.f32 %v114_v19  ;;  %v126_v25 = vand.u32 2147483648, %v114_v19  ;;  %vm120_vm4 = vweird.f32 %v114_v19  ;;  %v124_v26 = vand.u32 2147483647, %v114_v19 }
  0x9b   :  { %v127_v28 = vor.u32 1.1754944e-38, %v126_v25  ;;  %vm125_vm6 = vcmp.eq.f32.partialorder %v124_v26, 8.507059e+37 }
  0x9f   :  { %v778_v20 = vpop.eup %777 }
  0xa0   :  { %v116_v21 = vmul.f32 %v778_v20, %v114_v19  ;;  %vm121_vm3 = vweird.f32 %v778_v20 }
  0xa1   :  { %vm122_vm5 = vmor %vm120_vm4, %vm121_vm3 }
  0xa2   :  { %v117_v22 = vsub.f32 1.0, %v116_v21 }
  0xa4   :  { %v118_v23 = vmul.f32 %v778_v20, %v117_v22 }
  0xa6   :  { %v119_v24 = vadd.f32 %v778_v20, %v118_v23 }
  0xa8   :  { %v123_v27 = vsel %vm122_vm5, %v778_v20, %v119_v24 }
  0xa9   :  { %v128_v30 = vsel %vm125_vm6, %v127_v28, %v123_v27 }
 0x100   :  { %v138_v29 = vpop.permute.xlu0 %137 }
 0x101   :  { %v140_v31 = vmul.f32 %v138_v29, %v128_v30 }
 0x103   :  { %142 = vrot.lane.b32.xlu1 %v140_v31, %s853_s11 }
 0x175   :  { %v143_v32 = vpop.permute.xlu1 %142 }
 0x176   :  { %v145_v33 = vadd.f32 %v143_v32, %v924_v15 }
 0x178   :  { %779 = vtanh.f32 %v145_v33 }
 0x17e   :  { %v780_v34 = vpop.eup %779 }
 0x17f   :  { %148 = vrot.lane.b32.xlu1 %v780_v34, %s853_s11 }
 0x1f1   :  { %v149_v35 = vpop.permute.xlu1 %148 }
 0x1f2   :  { %v151_v36 = vsub.f32 %v909_v9, %v149_v35 }
 0x1f4   :  { %153 = vrot.lane.b32.xlu2 %v151_v36, %s854_s2 }
 0x24e   :  { %v154_v37 = vpop.permute.xlu2 %153 }
 0x24f   :  { %v156_v38 = vmul.f32 %v154_v37, %v128_v30 }
 0x251   :  { %158 = vrot.lane.b32.xlu2 %v156_v38, %s854_s2 }
 0x2ab   :  { %v159_v39 = vpop.permute.xlu2 %158 }
 0x2ac   :  { %v161_v40 = vadd.f32 %v780_v34, %v159_v39 }
 0x2ae   :  { %163 = vrot.lane.b32.xlu0 %v161_v40, %s853_s11 }
 0x320   :  { %v164_v41 = vpop.permute.xlu0 %163 }
 0x321   :  { %167 = vst.msk [vmem:[%s1060_s5] sm:$0x3] %vm40_vm0, %v164_v41  ;;  %745 = vmatmul.msk.f32.vlgmr.msra.gmra.mxu2 %vm86_vm2, %v164_v41 }
 0x3a4   :  { %v187_v42 = vpop.f32.mrf.mxu2 }
 0x3a5   :  { %v213_v43 = vadd.f32 %v187_v42, %v914_v10  ;;  %v191_v45 = vrot.slane %v187_v42, 6 }
 0x3a7   :  { %v215_v44 = vrot.slane %v213_v43, 6  ;;  %v193_v46 = vadd.f32 %v191_v45, %v924_v15 }
 0x3a9   :  { %216 = vrot.lane.b32.xlu1 %v215_v44, %s853_s11  ;;  %v746_v47 = vmul.f32 -1.442695, %v193_v46 }
 0x3ab   :  { %781 = vpow2.f32 %v746_v47 }
 0x3b1   :  { %v782_v48 = vpop.eup %781 }
 0x3b2   :  { %v197_v49 = vadd.f32 1.0, %v782_v48 }
 0x3b4   :  { %783 = vrcp.f32 %v197_v49  ;;  %v209_v55 = vand.u32 2147483648, %v197_v49  ;;  %vm203_vm8 = vweird.f32 %v197_v49  ;;  %v207_v56 = vand.u32 2147483647, %v197_v49 }
 0x3b6   :  { %v210_v58 = vor.u32 1.1754944e-38, %v209_v55  ;;  %vm208_vm10 = vcmp.eq.f32.partialorder %v207_v56, 8.507059e+37 }
 0x3ba   :  { %v784_v50 = vpop.eup %783 }
 0x3bb   :  { %v199_v51 = vmul.f32 %v784_v50, %v197_v49  ;;  %vm204_vm7 = vweird.f32 %v784_v50 }
 0x3bc   :  { %vm205_vm9 = vmor %vm203_vm8, %vm204_vm7 }
 0x3bd   :  { %v200_v52 = vsub.f32 1.0, %v199_v51 }
 0x3bf   :  { %v201_v53 = vmul.f32 %v784_v50, %v200_v52 }
 0x3c1   :  { %v202_v54 = vadd.f32 %v784_v50, %v201_v53 }
 0x3c3   :  { %v206_v57 = vsel %vm205_vm9, %v784_v50, %v202_v54 }
 0x3c4   :  { %v211_v60 = vsel %vm208_vm10, %v210_v58, %v206_v57 }
 0x41b   :  { %v217_v59 = vpop.permute.xlu1 %216 }
 0x41c   :  { %v219_v61 = vmul.f32 %v217_v59, %v211_v60 }
 0x41e   :  { %221 = vrot.lane.b32.xlu2 %v219_v61, %s853_s11 }
 0x478   :  { %v222_v62 = vpop.permute.xlu2 %221 }
 0x479   :  { %v224_v63 = vadd.f32 %v222_v62, %v924_v15 }
 0x47b   :  { %785 = vtanh.f32 %v224_v63 }
 0x481   :  { %v786_v0 = vpop.eup %785 }
 0x482   :  { %v227_v1 = vrot.slane %v786_v0, 2 }
 0x484   :  { %v229_v2 = vsub.f32 %v161_v40, %v227_v1 }
 0x486   :  { %v231_v3 = vrot.slane %v229_v2, 6 }
 0x488   :  { %232 = vrot.lane.b32.xlu0 %v231_v3, %s855_s14 }
 0x4fa   :  { %v233_v4 = vpop.permute.xlu0 %232 }
 0x4fb   :  { %v235_v5 = vmul.f32 %v233_v4, %v211_v60 }
 0x4fd   :  { %237 = vrot.lane.b32.xlu1 %v235_v5, %s854_s2 }
 0x56f   :  { %v238_v6 = vpop.permute.xlu1 %237 }
 0x570   :  { %v946_v7 = vadd.f32 %v786_v0, %v238_v6 }
 0x572   :  { %v248_v8 = vrot.slane %v946_v7, 2 }
 0x574   :  { %249 = vrot.lane.b32.xlu2 %v248_v8, %s853_s11 }
 0x5ce   :  { %v250_v9 = vpop.permute.xlu2 %249 }
 0x5cf   :  { %748 = vmatmul.msk.f32.vlgmr.msra.gmra.mxu3 %vm86_vm2, %v250_v9 }
 0x652   :  { %v270_v11 = vpop.f32.mrf.mxu3 }
 0x653   :  { %v296_v12 = vadd.f32 %v270_v11, %v914_v10  ;;  %v274_v16 = vrot.slane %v270_v11, 4 }
 0x655   :  { %v298_v14 = vrot.slane %v296_v12, 4  ;;  %v276_v17 = vadd.f32 %v274_v16, %v924_v15 }
 0x657   :  { %299 = vrot.lane.b32.xlu0 %v298_v14, %s853_s11  ;;  %v749_v18 = vmul.f32 -1.442695, %v276_v17 }
 0x659   :  { %787 = vpow2.f32 %v749_v18 }
 0x65f   :  { %v788_v19 = vpop.eup %787 }
 0x660   :  { %v280_v20 = vadd.f32 1.0, %v788_v19 }
 0x662   :  { %789 = vrcp.f32 %v280_v20  ;;  %v292_v26 = vand.u32 2147483648, %v280_v20  ;;  %vm286_vm12 = vweird.f32 %v280_v20  ;;  %v290_v27 = vand.u32 2147483647, %v280_v20 }
 0x664   :  { %v293_v29 = vor.u32 1.1754944e-38, %v292_v26  ;;  %vm291_vm14 = vcmp.eq.f32.partialorder %v290_v27, 8.507059e+37 }
 0x668   :  { %v790_v21 = vpop.eup %789 }
 0x669   :  { %v282_v22 = vmul.f32 %v790_v21, %v280_v20  ;;  %vm287_vm11 = vweird.f32 %v790_v21 }
 0x66a   :  { %vm288_vm13 = vmor %vm286_vm12, %vm287_vm11 }
 0x66b   :  { %v283_v23 = vsub.f32 1.0, %v282_v22 }
 0x66d   :  { %v284_v24 = vmul.f32 %v790_v21, %v283_v23 }
 0x66f   :  { %v285_v25 = vadd.f32 %v790_v21, %v284_v24 }
 0x671   :  { %v289_v28 = vsel %vm288_vm13, %v790_v21, %v285_v25 }
 0x672   :  { %v294_v31 = vsel %vm291_vm14, %v293_v29, %v289_v28 }
 0x6c9   :  { %v300_v30 = vpop.permute.xlu0 %299 }
 0x6ca   :  { %v302_v32 = vmul.f32 %v300_v30, %v294_v31 }
 0x6cc   :  { %304 = vrot.lane.b32.xlu1 %v302_v32, %s853_s11 }
 0x73e   :  { %v305_v33 = vpop.permute.xlu1 %304 }
 0x73f   :  { %v307_v34 = vadd.f32 %v305_v33, %v924_v15 }
 0x741   :  { %791 = vtanh.f32 %v307_v34 }
 0x747   :  { %v792_v35 = vpop.eup %791 }
 0x748   :  { %v310_v36 = vrot.slane %v792_v35, 2 }
 0x74a   :  { %v312_v37 = vsub.f32 %v946_v7, %v310_v36 }
 0x74c   :  { %v314_v38 = vrot.slane %v312_v37, 6 }
 0x74e   :  { %315 = vrot.lane.b32.xlu2 %v314_v38, %s855_s14 }
 0x7a8   :  { %v316_v39 = vpop.permute.xlu2 %315 }
 0x7a9   :  { %v318_v40 = vmul.f32 %v316_v39, %v294_v31 }
 0x7ab   :  { %320 = vrot.lane.b32.xlu0 %v318_v40, %s854_s2 }
 0x81d   :  { %v321_v41 = vpop.permute.xlu0 %320 }
 0x81e   :  { %v959_v42 = vadd.f32 %v792_v35, %v321_v41 }
 0x820   :  { %v331_v43 = vrot.slane %v959_v42, 4 }
 0x822   :  { %332 = vrot.lane.b32.xlu1 %v331_v43, %s853_s11 }
 0x894   :  { %v333_v44 = vpop.permute.xlu1 %332 }
 0x895   :  { %751 = vmatmul.msk.f32.vlgmr.msrb.gmra.mxu1 %vm86_vm2, %v333_v44 }
 0x912   :  { %v353_v45 = vpop.f32.mrf.mxu1 }
 0x913   :  { %v379_v46 = vadd.f32 %v353_v45, %v914_v10  ;;  %v357_v48 = vrot.slane %v353_v45, 2 }
 0x915   :  { %v381_v47 = vrot.slane %v379_v46, 2  ;;  %v359_v49 = vadd.f32 %v357_v48, %v924_v15 }
 0x917   :  { %382 = vrot.lane.b32.xlu2 %v381_v47, %s853_s11  ;;  %v752_v50 = vmul.f32 -1.442695, %v359_v49 }
 0x919   :  { %793 = vpow2.f32 %v752_v50 }
 0x91f   :  { %v794_v51 = vpop.eup %793 }
 0x920   :  { %v363_v52 = vadd.f32 1.0, %v794_v51 }
 0x922   :  { %795 = vrcp.f32 %v363_v52  ;;  %v375_v58 = vand.u32 2147483648, %v363_v52  ;;  %vm369_vm3 = vweird.f32 %v363_v52  ;;  %v373_v59 = vand.u32 2147483647, %v363_v52 }
 0x924   :  { %v376_v61 = vor.u32 1.1754944e-38, %v375_v58  ;;  %vm374_vm5 = vcmp.eq.f32.partialorder %v373_v59, 8.507059e+37 }
 0x928   :  { %v796_v53 = vpop.eup %795 }
 0x929   :  { %v365_v54 = vmul.f32 %v796_v53, %v363_v52  ;;  %vm370_vm15 = vweird.f32 %v796_v53 }
 0x92a   :  { %vm371_vm4 = vmor %vm369_vm3, %vm370_vm15 }
 0x92b   :  { %v366_v55 = vsub.f32 1.0, %v365_v54 }
 0x92d   :  { %v367_v56 = vmul.f32 %v796_v53, %v366_v55 }
 0x92f   :  { %v368_v57 = vadd.f32 %v796_v53, %v367_v56 }
 0x931   :  { %v372_v60 = vsel %vm371_vm4, %v796_v53, %v368_v57 }
 0x932   :  { %v377_v63 = vsel %vm374_vm5, %v376_v61, %v372_v60 }
 0x971   :  { %v383_v62 = vpop.permute.xlu2 %382 }
 0x972   :  { %v385_v0 = vmul.f32 %v383_v62, %v377_v63 }
 0x974   :  { %387 = vrot.lane.b32.xlu0 %v385_v0, %s853_s11 }
 0x9e6   :  { %v388_v1 = vpop.permute.xlu0 %387 }
 0x9e7   :  { %v390_v2 = vadd.f32 %v388_v1, %v924_v15  ;;  %v43_v15 = vld [vmem:[%s1055_s0 + $0x8] sm:$0xff] }
 0x9e8   :  { %742 = vmatmul.msk.f32.gmra.mxu0 %vm50_vm1, %v43_v15 }
 0x9e9   :  { %797 = vtanh.f32 %v390_v2 }
 0x9ef   :  { %v798_v3 = vpop.eup %797 }
 0x9f0   :  { %v393_v4 = vrot.slane %v798_v3, 2 }
 0x9f2   :  { %v395_v5 = vsub.f32 %v959_v42, %v393_v4 }
 0x9f4   :  { %v397_v6 = vrot.slane %v395_v5, 6 }
 0x9f6   :  { %398 = vrot.lane.b32.xlu1 %v397_v6, %s855_s14 }
 0xa65   :  { %v77_v19 = vpop.f32.mrf.mxu0 }
 0xa66   :  { %v984_v20 = vadd.f32 %v921_v13, %v77_v19 }
 0xa68   :  { %v399_v8 = vpop.permute.xlu1 %398 }
 0xa69   :  { %v401_v9 = vmul.f32 %v399_v8, %v377_v63 }
 0xa6b   :  { %403 = vrot.lane.b32.xlu2 %v401_v9, %s854_s2 }
 0xac5   :  { %v404_v11 = vpop.permute.xlu2 %403 }
 0xac6   :  { %v972_v12 = vadd.f32 %v798_v3, %v404_v11 }
 0xac8   :  { %v414_v14 = vrot.slane %v972_v12, 6 }
 0xaca   :  { %415 = vrot.lane.b32.xlu0 %v414_v14, %s853_s11 }
 0xb3c   :  { %v416_v16 = vpop.permute.xlu0 %415 }
 0xb3d   :  { %754 = vmatmul.msk.f32.vlgmr.msrb.gmra.mxu2 %vm86_vm2, %v416_v16 }
 0xbc0   :  { %v436_v17 = vpop.f32.mrf.mxu2 }
 0xbc1   :  { %v459_v18 = vadd.f32 %v436_v17, %v914_v10  ;;  %v439_v21 = vadd.f32 %v436_v17, %v984_v20 }
 0xbc3   :  { %461 = vrot.lane.b32.xlu1 %v459_v18, %s853_s11  ;;  %v755_v22 = vmul.f32 -1.442695, %v439_v21 }
 0xbc5   :  { %799 = vpow2.f32 %v755_v22 }
 0xbcb   :  { %v800_v23 = vpop.eup %799 }
 0xbcc   :  { %v443_v24 = vadd.f32 1.0, %v800_v23 }
 0xbce   :  { %801 = vrcp.f32 %v443_v24  ;;  %v455_v30 = vand.u32 2147483648, %v443_v24  ;;  %vm449_vm6 = vweird.f32 %v443_v24  ;;  %v453_v31 = vand.u32 2147483647, %v443_v24 }
 0xbd0   :  { %v456_v13 = vor.u32 1.1754944e-38, %v455_v30  ;;  %vm454_vm8 = vcmp.eq.f32.partialorder %v453_v31, 8.507059e+37 }
 0xbd4   :  { %v802_v25 = vpop.eup %801 }
 0xbd5   :  { %v445_v26 = vmul.f32 %v802_v25, %v443_v24  ;;  %vm450_vm1 = vweird.f32 %v802_v25 }
 0xbd6   :  { %vm451_vm7 = vmor %vm449_vm6, %vm450_vm1  ;;  %vm246_vm1 = vcmask 257026   ;;  %vm329_vm6 = vcmask 259076  }
 0xbd7   :  { %v446_v27 = vsub.f32 1.0, %v445_v26 }
 0xbd9   :  { %v447_v28 = vmul.f32 %v802_v25, %v446_v27 }
 0xbdb   :  { %v448_v29 = vadd.f32 %v802_v25, %v447_v28 }
 0xbdd   :  { %v452_v32 = vsel %vm451_vm7, %v802_v25, %v448_v29  ;;  %vm412_vm7 = vcmask 261126  }
 0xbde   :  { %v457_v34 = vsel %vm454_vm8, %v456_v13, %v452_v32 }
 0xc35   :  { %v462_v33 = vpop.permute.xlu1 %461 }
 0xc36   :  { %v464_v35 = vmul.f32 %v462_v33, %v457_v34 }
 0xc38   :  { %466 = vrot.lane.b32.xlu2 %v464_v35, %s853_s11 }
 0xc92   :  { %v467_v36 = vpop.permute.xlu2 %466 }
 0xc93   :  { %v469_v37 = vadd.f32 %v467_v36, %v984_v20 }
 0xc95   :  { %803 = vtanh.f32 %v469_v37 }
 0xc9b   :  { %v804_v38 = vpop.eup %803 }
 0xc9c   :  { %v472_v39 = vrot.slane %v804_v38, 2 }
 0xc9e   :  { %v474_v40 = vsub.f32 %v972_v12, %v472_v39 }
 0xca0   :  { %v476_v41 = vrot.slane %v474_v40, 6 }
 0xca2   :  { %477 = vrot.lane.b32.xlu0 %v476_v41, %s855_s14 }
 0xd14   :  { %v478_v43 = vpop.permute.xlu0 %477 }
 0xd15   :  { %v480_v44 = vmul.f32 %v478_v43, %v457_v34 }
 0xd17   :  { %482 = vrot.lane.b32.xlu1 %v480_v44, %s854_s2 }
 0xd89   :  { %v483_v45 = vpop.permute.xlu1 %482 }
 0xd8a   :  { %v485_v46 = vadd.f32 %v804_v38, %v483_v45 }
 0xd8c   :  { %487 = vrot.lane.b32.xlu2 %v485_v46, %s853_s11 }
 0xde6   :  { %v488_v47 = vpop.permute.xlu2 %487 }
 0xde7   :  { %756 = vst.msk [vmem:[%s1060_s5 + $0x8] sm:$0x3] %vm40_vm0, %v488_v47  ;;  %757 = vmatmul.msk.f32.vlgmr.msrb.gmra.mxu3 %vm86_vm2, %v488_v47 }
 0xe6a   :  { %v511_v48 = vpop.f32.mrf.mxu3 }
 0xe6b   :  { %v537_v49 = vadd.f32 %v511_v48, %v914_v10  ;;  %v515_v51 = vrot.slane %v511_v48, 6 }
 0xe6d   :  { %v539_v50 = vrot.slane %v537_v49, 6  ;;  %v517_v52 = vadd.f32 %v515_v51, %v984_v20 }
 0xe6f   :  { %540 = vrot.lane.b32.xlu0 %v539_v50, %s853_s11  ;;  %v758_v53 = vmul.f32 -1.442695, %v517_v52 }
 0xe71   :  { %805 = vpow2.f32 %v758_v53 }
 0xe77   :  { %v806_v54 = vpop.eup %805 }
 0xe78   :  { %v521_v55 = vadd.f32 1.0, %v806_v54 }
 0xe7a   :  { %807 = vrcp.f32 %v521_v55  ;;  %v533_v61 = vand.u32 2147483648, %v521_v55  ;;  %vm527_vm9 = vweird.f32 %v521_v55  ;;  %v531_v62 = vand.u32 2147483647, %v521_v55 }
 0xe7c   :  { %v534_v0 = vor.u32 1.1754944e-38, %v533_v61  ;;  %vm532_vm11 = vcmp.eq.f32.partialorder %v531_v62, 8.507059e+37 }
 0xe80   :  { %v808_v56 = vpop.eup %807 }
 0xe81   :  { %v523_v57 = vmul.f32 %v808_v56, %v521_v55  ;;  %vm528_vm0 = vweird.f32 %v808_v56 }
 0xe82   :  { %vm529_vm10 = vmor %vm527_vm9, %vm528_vm0 }
 0xe83   :  { %v524_v58 = vsub.f32 1.0, %v523_v57 }
 0xe85   :  { %v525_v59 = vmul.f32 %v808_v56, %v524_v58 }
 0xe87   :  { %v526_v60 = vadd.f32 %v808_v56, %v525_v59 }
 0xe89   :  { %v530_v63 = vsel %vm529_vm10, %v808_v56, %v526_v60 }
 0xe8a   :  { %v535_v2 = vsel %vm532_vm11, %v534_v0, %v530_v63 }
 0xee1   :  { %v541_v1 = vpop.permute.xlu0 %540 }
 0xee2   :  { %v543_v3 = vmul.f32 %v541_v1, %v535_v2 }
 0xee4   :  { %545 = vrot.lane.b32.xlu1 %v543_v3, %s853_s11 }
 0xf56   :  { %v546_v4 = vpop.permute.xlu1 %545 }
 0xf57   :  { %v548_v5 = vadd.f32 %v546_v4, %v984_v20 }
 0xf59   :  { %809 = vtanh.f32 %v548_v5 }
 0xf5f   :  { %v810_v6 = vpop.eup %809 }
 0xf60   :  { %v551_v8 = vrot.slane %v810_v6, 2 }
 0xf62   :  { %v553_v9 = vsub.f32 %v485_v46, %v551_v8 }
 0xf64   :  { %v555_v11 = vrot.slane %v553_v9, 6 }
 0xf66   :  { %556 = vrot.lane.b32.xlu2 %v555_v11, %s855_s14 }
 0xfc0   :  { %v557_v14 = vpop.permute.xlu2 %556 }
 0xfc1   :  { %v559_v15 = vmul.f32 %v557_v14, %v535_v2 }
 0xfc3   :  { %561 = vrot.lane.b32.xlu0 %v559_v15, %s854_s2 }
0x1035   :  { %v562_v16 = vpop.permute.xlu0 %561 }
0x1036   :  { %v1005_v17 = vadd.f32 %v810_v6, %v562_v16 }
0x1038   :  { %v571_v18 = vrot.slane %v1005_v17, 2 }
0x103a   :  { %572 = vrot.lane.b32.xlu1 %v571_v18, %s853_s11 }
0x10ac   :  { %v573_v19 = vpop.permute.xlu1 %572 }
0x10ad   :  { %760 = vmatmul.msk.f32.vlgmr.msrb.gmra.mxu0 %vm86_vm2, %v573_v19 }
0x112a   :  { %v593_v21 = vpop.f32.mrf.mxu0 }
0x112b   :  { %v619_v22 = vadd.f32 %v593_v21, %v914_v10  ;;  %v597_v24 = vrot.slane %v593_v21, 4 }
0x112d   :  { %v621_v23 = vrot.slane %v619_v22, 4  ;;  %v599_v25 = vadd.f32 %v597_v24, %v984_v20 }
0x112f   :  { %622 = vrot.lane.b32.xlu2 %v621_v23, %s853_s11  ;;  %v761_v26 = vmul.f32 -1.442695, %v599_v25 }
0x1131   :  { %811 = vpow2.f32 %v761_v26 }
0x1137   :  { %v812_v27 = vpop.eup %811 }
0x1138   :  { %v603_v28 = vadd.f32 1.0, %v812_v27 }
0x113a   :  { %813 = vrcp.f32 %v603_v28  ;;  %v615_v33 = vand.u32 2147483648, %v603_v28  ;;  %vm609_vm13 = vweird.f32 %v603_v28  ;;  %v613_v34 = vand.u32 2147483647, %v603_v28 }
0x113c   :  { %v616_v36 = vor.u32 1.1754944e-38, %v615_v33  ;;  %vm614_vm15 = vcmp.eq.f32.partialorder %v613_v34, 8.507059e+37 }
0x1140   :  { %v814_v29 = vpop.eup %813 }
0x1141   :  { %v605_v30 = vmul.f32 %v814_v29, %v603_v28  ;;  %vm610_vm12 = vweird.f32 %v814_v29 }
0x1142   :  { %vm611_vm14 = vmor %vm609_vm13, %vm610_vm12 }
0x1143   :  { %v606_v31 = vsub.f32 1.0, %v605_v30 }
0x1145   :  { %v607_v32 = vmul.f32 %v814_v29, %v606_v31 }
0x1147   :  { %v608_v13 = vadd.f32 %v814_v29, %v607_v32 }
0x1149   :  { %v612_v35 = vsel %vm611_vm14, %v814_v29, %v608_v13 }
0x114a   :  { %v617_v38 = vsel %vm614_vm15, %v616_v36, %v612_v35 }
0x1189   :  { %v623_v37 = vpop.permute.xlu2 %622 }
0x118a   :  { %v625_v39 = vmul.f32 %v623_v37, %v617_v38 }
0x118c   :  { %627 = vrot.lane.b32.xlu0 %v625_v39, %s853_s11 }
0x11fe   :  { %v628_v40 = vpop.permute.xlu0 %627 }
0x11ff   :  { %v630_v41 = vadd.f32 %v628_v40, %v984_v20 }
0x1201   :  { %815 = vtanh.f32 %v630_v41 }
0x1207   :  { %v816_v43 = vpop.eup %815 }
0x1208   :  { %v633_v44 = vrot.slane %v816_v43, 2 }
0x120a   :  { %v635_v45 = vsub.f32 %v1005_v17, %v633_v44 }
0x120c   :  { %v637_v46 = vrot.slane %v635_v45, 6 }
0x120e   :  { %638 = vrot.lane.b32.xlu1 %v637_v46, %s855_s14 }
0x1280   :  { %v639_v47 = vpop.permute.xlu1 %638 }
0x1281   :  { %v641_v48 = vmul.f32 %v639_v47, %v617_v38 }
0x1283   :  { %643 = vrot.lane.b32.xlu2 %v641_v48, %s854_s2 }
0x12dd   :  { %v644_v49 = vpop.permute.xlu2 %643 }
0x12de   :  { %v646_v50 = vadd.f32 %v816_v43, %v644_v49 }
0x12e0   :  { %v653_v51 = vrot.slane %v646_v50, 4 }
0x12e2   :  { %654 = vrot.lane.b32.xlu0 %v653_v51, %s853_s11 }
0x1354   :  { %v655_v52 = vpop.permute.xlu0 %654 }
0x1355   :  { %763 = vmatmul.msk.f32.vlgmr.msra.gmra.mxu1 %vm86_vm2, %v655_v52 }
0x13d2   :  { %v675_v53 = vpop.f32.mrf.mxu1 }
0x13d3   :  { %v701_v54 = vadd.f32 %v675_v53, %v914_v10  ;;  %v679_v56 = vrot.slane %v675_v53, 2 }
0x13d5   :  { %v703_v55 = vrot.slane %v701_v54, 2  ;;  %v681_v57 = vadd.f32 %v679_v56, %v984_v20 }
0x13d7   :  { %704 = vrot.lane.b32.xlu1 %v703_v55, %s853_s11  ;;  %v764_v58 = vmul.f32 -1.442695, %v681_v57 }
0x13d9   :  { %817 = vpow2.f32 %v764_v58 }
0x13df   :  { %v818_v59 = vpop.eup %817 }
0x13e0   :  { %v685_v60 = vadd.f32 1.0, %v818_v59 }
0x13e2   :  { %819 = vrcp.f32 %v685_v60  ;;  %v697_v2 = vand.u32 2147483648, %v685_v60  ;;  %vm691_vm3 = vweird.f32 %v685_v60  ;;  %v695_v10 = vand.u32 2147483647, %v685_v60 }
0x13e4   :  { %v698_v4 = vor.u32 1.1754944e-38, %v697_v2  ;;  %vm696_vm5 = vcmp.eq.f32.partialorder %v695_v10, 8.507059e+37 }
0x13e8   :  { %v820_v61 = vpop.eup %819 }
0x13e9   :  { %v687_v62 = vmul.f32 %v820_v61, %v685_v60  ;;  %vm692_vm2 = vweird.f32 %v820_v61 }
0x13ea   :  { %vm693_vm4 = vmor %vm691_vm3, %vm692_vm2 }
0x13eb   :  { %v688_v63 = vsub.f32 1.0, %v687_v62 }
0x13ed   :  { %v689_v0 = vmul.f32 %v820_v61, %v688_v63 }
0x13ef   :  { %v690_v1 = vadd.f32 %v820_v61, %v689_v0 }
0x13f1   :  { %v694_v3 = vsel %vm693_vm4, %v820_v61, %v690_v1 }
0x13f2   :  { %v699_v6 = vsel %vm696_vm5, %v698_v4, %v694_v3 }
0x1449   :  { %v705_v5 = vpop.permute.xlu1 %704 }
0x144a   :  { %v707_v8 = vmul.f32 %v705_v5, %v699_v6 }
0x144c   :  { %709 = vrot.lane.b32.xlu2 %v707_v8, %s853_s11 }
0x1454   :  { %242 = vrot.lane.b32.xlu2 %v946_v7, %s853_s11 }
0x145c   :  { %566 = vrot.lane.b32.xlu2 %v1005_v17, %s853_s11 }
0x14a6   :  { %v710_v9 = vpop.permute.xlu2 %709 }
0x14a7   :  { %v712_v11 = vadd.f32 %v710_v9, %v984_v20 }
0x14a9   :  { %821 = vtanh.f32 %v712_v11 }
0x14ae   :  { %v243_v14 = vpop.permute.xlu2 %242 }
0x14af   :  { %v822_v15 = vpop.eup %821  ;;  %747 = vst.msk [vmem:[%s1060_s5] sm:$0xc] %vm246_vm1, %v243_v14 }
0x14b0   :  { %v715_v16 = vrot.slane %v822_v15, 2 }
0x14b2   :  { %v717_v18 = vsub.f32 %v646_v50, %v715_v16 }
0x14b4   :  { %v719_v19 = vrot.slane %v717_v18, 6 }
0x14b6   :  { %720 = vrot.lane.b32.xlu0 %v719_v19, %s855_s14  ;;  %v567_v7 = vpop.permute.xlu2 %566 }
0x14b7   :  { %759 = vst.msk [vmem:[%s1060_s5 + $0x8] sm:$0xc] %vm246_vm1, %v567_v7 }
0x14be   :  { %325 = vrot.lane.b32.xlu0 %v959_v42, %s853_s11 }
0x14c6   :  { %648 = vrot.lane.b32.xlu0 %v646_v50, %s853_s11 }
0x1528   :  { %v721_v20 = vpop.permute.xlu0 %720 }
0x1529   :  { %v723_v17 = vmul.f32 %v721_v20, %v699_v6 }
0x152b   :  { %725 = vrot.lane.b32.xlu1 %v723_v17, %s854_s2 }
0x1530   :  { %v326_v21 = vpop.permute.xlu0 %325 }
0x1531   :  { %750 = vst.msk [vmem:[%s1060_s5] sm:$0x30] %vm329_vm6, %v326_v21 }
0x1533   :  { %408 = vrot.lane.b32.xlu1 %v972_v12, %s853_s11 }
0x1538   :  { %v649_v22 = vpop.permute.xlu0 %648 }
0x1539   :  { %762 = vst.msk [vmem:[%s1060_s5 + $0x8] sm:$0x30] %vm329_vm6, %v649_v22 }
0x159d   :  { %v726_v42 = vpop.permute.xlu1 %725 }
0x159e   :  { %v728_v23 = vadd.f32 %v822_v15, %v726_v42 }
0x15a0   :  { %730 = vrot.lane.b32.xlu1 %v728_v23, %s853_s11 }
0x15a5   :  { %v409_v24 = vpop.permute.xlu1 %408 }
0x15a6   :  { %753 = vst.msk [vmem:[%s1060_s5] sm:$0xc0] %vm412_vm7, %v409_v24 }
0x1612   :  { %v731_v25 = vpop.permute.xlu1 %730 }
0x1613   :  { %765 = vst.msk [vmem:[%s1060_s5 + $0x8] sm:$0xc0] %vm412_vm7, %v731_v25 }
0x1614   :  { %735 = vst.msk [vmem:[#allocation2 - $0x6] sm:$0xc0] %vm412_vm7, %v731_v25 }
0x1615   :  { %740 = vsyncpa [#allocation4], 1 }

// kernel: classifier_forward.4
= control target key start
LH: loop header
LB: loop body
LE: loop exit
PB: predicated region body
PF: predicated region fallthrough
CT: control target
= control target key end

     0   :  { %10 = vsyncpa [#allocation4], 0  ;;  %s1092_s0 = inlined_call_operand.vmem [shape: f32[16,32], index: 0, kind: input, shape index: {}]   ;;  %s1093_s1 = inlined_call_operand.hbm [shape: f32[32,96], index: 1, kind: input, shape index: {}]   ;;  %s1094_s2 = inlined_call_operand.vmem [shape: f32[1,96], index: 2, kind: input, shape index: {}]   ;;  %s1095_s3 = inlined_call_operand.hbm [shape: f32[32,96], index: 3, kind: input, shape index: {}]   ;;  %s1096_s4 = inlined_call_operand.vmem [shape: f32[1,32], index: 4, kind: input, shape index: {}]   ;;  %s1097_s5 = inlined_call_operand.vmem [shape: f32[8,2,32], index: 5, kind: output, shape index: {}]  }
   0x1   :  { %s18_s20 = sshll.u32 %s1093_s1, 4  ;;  %s19_s20 = int_to_ptr.hbm [resolvable:$true] %s18_s20 }
   0x2   :  { %11 = vsyncpa [#allocation6], 0  ;;  %s894_s21 = smov [#allocation3]   ;;  %s33_s25 = sshll.u32 %s1095_s3, 4  ;;  %s34_s25 = int_to_ptr.hbm [resolvable:$true] %s33_s25 }
   0x3   :  { %s20_s22 = sshll.u32 %s894_s21, 4  ;;  %s895_s26 = smov 128   ;;  %s21_s22 = int_to_ptr.vmem [resolvable:$true] %s20_s22 }
   0x4   :  { %s896_s27 = smov 8   ;;  %s897_s28 = smov [#allocation5]  }
   0x5   :  { %26 = dma.hbm_to_vmem [thread:$0]  %s19_s20, 512, %s21_s22, [#allocation4], %s895_s26, %s895_s26, %s896_s27  }
   0x6   :  { %s35_s29 = sshll.u32 %s897_s28, 4  ;;  %s36_s29 = int_to_ptr.vmem [resolvable:$true] %s35_s29 }
   0x7   :  { %41 = dma.hbm_to_vmem [thread:$0]  %s34_s25, 512, %s36_s29, [#allocation6], %s895_s26, %s895_s26, %s896_s27  }
   0x8   :  { %890 = dma.done.wait [#allocation4], 512  }
   0x9   :  { %891 = vsyncadd [#allocation4], 4294966784 }
   0xa   :  { %892 = dma.done.wait [#allocation6], 512  }
   0xb   :  { %893 = vsyncadd [#allocation6], 4294966784  ;;  %vm56_vm0 = vcmask 254976   ;;  %v898_v0 = vmov 0.0   ;;  %v63_v1 = vld [vmem:[#allocation3 + $0x18] sm:$0xff]  ;;  %v62_v3 = vld [vmem:[#allocation3 + $0x10] sm:$0xff] }
   0xc   :  { %57 = vst.msk [vmem:[#allocation2] sm:$0x3] %vm56_vm0, %v898_v0  ;;  %v101_v2 = vld [vmem:[#allocation5 + $0x18] sm:$0xff]  ;;  %87 = vmatpush.msra.mxu0 %v63_v1  ;;  %v100_v4 = vld [vmem:[#allocation5 + $0x10] sm:$0xff]  ;;  %v61_v5 = vld [vmem:[#allocation3 + $0x8] sm:$0xff]  ;;  %vm68_vm1 = vcmask 261120  }
   0xd   :  { %119 = vmatpush.msra.mxu1 %v101_v2  ;;  %v99_v6 = vld [vmem:[#allocation5 + $0x8] sm:$0xff]  ;;  %199 = vmatpush.msra.mxu2 %v101_v2  ;;  %v792_v7 = vld [vmem:[%s1096_s4] ss:$0 sm:$0xff]  ;;  %v60_v8 = vld [vmem:[#allocation3] sm:$0xff]  ;;  %s899_s7 = smov 64   ;;  %s901_s11 = smov 96  }
   0xe   :  { %282 = vmatpush.msra.mxu3 %v101_v2  ;;  %88 = vmatpush.msra.mxu0 %v62_v3  ;;  %v98_v9 = vld [vmem:[#allocation5] sm:$0xff]  ;;  %v958_v15 = vld [vmem:[%s1094_s2] ss:$0 sm:$0xff]  ;;  %s900_s2 = smov 32  }
   0xf   :  { %120 = vmatpush.msra.mxu1 %v100_v4  ;;  %200 = vmatpush.msra.mxu2 %v100_v4  ;;  %v58_v10 = vld [vmem:[%s1092_s0] sm:$0xff] }
  0x10   :  { %283 = vmatpush.msra.mxu3 %v100_v4  ;;  %89 = vmatpush.msra.mxu0 %v61_v5 }
  0x11   :  { %121 = vmatpush.msra.mxu1 %v99_v6  ;;  %149 = vrot.lane.b32.xlu0 %v792_v7, %s899_s7 }
  0x12   :  { %201 = vmatpush.msra.mxu2 %v99_v6  ;;  %90 = vmatpush.msra.mxu0 %v60_v8 }
  0x13   :  { %v945_v11 = vld [vmem:[#allocation2] sm:$0x3]  ;;  %122 = vmatpush.msra.mxu1 %v98_v9  ;;  %759 = vmatmul.msk.f32.vlgmr.msra.gmra.mxu0 %vm68_vm1, %v58_v10 }
  0x14   :  { %761 = vmatmul.msk.f32.vlgmr.msra.gmra.mxu1 %vm68_vm1, %v945_v11  ;;  %202 = vmatpush.msra.mxu2 %v98_v9 }
  0x15   :  { %284 = vmatpush.msra.mxu3 %v99_v6  ;;  %365 = vmatpush.msrb.mxu1 %v101_v2 }
  0x16   :  { %448 = vmatpush.msrb.mxu2 %v101_v2  ;;  %605 = vmatpush.msrb.mxu0 %v101_v2 }
  0x17   :  { %285 = vmatpush.msra.mxu3 %v98_v9  ;;  %366 = vmatpush.msrb.mxu1 %v100_v4 }
  0x18   :  { %449 = vmatpush.msrb.mxu2 %v100_v4  ;;  %606 = vmatpush.msrb.mxu0 %v100_v4 }
  0x19   :  { %523 = vmatpush.msrb.mxu3 %v101_v2  ;;  %367 = vmatpush.msrb.mxu1 %v99_v6 }
  0x1a   :  { %450 = vmatpush.msrb.mxu2 %v99_v6  ;;  %607 = vmatpush.msrb.mxu0 %v99_v6 }
  0x1b   :  { %524 = vmatpush.msrb.mxu3 %v100_v4  ;;  %368 = vmatpush.msrb.mxu1 %v98_v9 }
  0x1c   :  { %451 = vmatpush.msrb.mxu2 %v98_v9  ;;  %608 = vmatpush.msrb.mxu0 %v98_v9 }
  0x1d   :  { %525 = vmatpush.msrb.mxu3 %v99_v6  ;;  %687 = vmatpush.msra.mxu1 %v101_v2 }
  0x1f   :  { %526 = vmatpush.msrb.mxu3 %v98_v9  ;;  %688 = vmatpush.msra.mxu1 %v100_v4 }
  0x21   :  { %689 = vmatpush.msra.mxu1 %v99_v6 }
  0x23   :  { %690 = vmatpush.msra.mxu1 %v98_v9 }
  0x83   :  { %v951_v12 = vpop.permute.xlu0 %149 }
  0x90   :  { %v92_v16 = vpop.f32.mrf.mxu0 }
  0x91   :  { %v124_v13 = vpop.f32.mrf.mxu1  ;;  %v961_v17 = vadd.f32 %v958_v15, %v92_v16 }
  0x92   :  { %v152_v14 = vadd.f32 %v951_v12, %v124_v13 }
  0x93   :  { %v127_v18 = vadd.f32 %v124_v13, %v961_v17 }
  0x94   :  { %154 = vrot.lane.b32.xlu0 %v152_v14, %s899_s7 }
  0x95   :  { %v762_v19 = vmul.f32 -1.442695, %v127_v18 }
  0x97   :  { %794 = vpow2.f32 %v762_v19 }
  0x9d   :  { %v795_v20 = vpop.eup %794 }
  0x9e   :  { %v131_v21 = vadd.f32 1.0, %v795_v20 }
  0xa0   :  { %796 = vrcp.f32 %v131_v21  ;;  %v143_v27 = vand.u32 2147483648, %v131_v21  ;;  %vm137_vm3 = vweird.f32 %v131_v21  ;;  %v141_v28 = vand.u32 2147483647, %v131_v21 }
  0xa2   :  { %v144_v30 = vor.u32 1.1754944e-38, %v143_v27  ;;  %vm142_vm5 = vcmp.eq.f32.partialorder %v141_v28, 8.507059e+37 }
  0xa6   :  { %v797_v22 = vpop.eup %796 }
  0xa7   :  { %v133_v23 = vmul.f32 %v797_v22, %v131_v21  ;;  %vm138_vm2 = vweird.f32 %v797_v22 }
  0xa8   :  { %vm139_vm4 = vmor %vm137_vm3, %vm138_vm2 }
  0xa9   :  { %v134_v24 = vsub.f32 1.0, %v133_v23 }
  0xab   :  { %v135_v25 = vmul.f32 %v797_v22, %v134_v24 }
  0xad   :  { %v136_v26 = vadd.f32 %v797_v22, %v135_v25 }
  0xaf   :  { %v140_v29 = vsel %vm139_vm4, %v797_v22, %v136_v26 }
  0xb0   :  { %v145_v32 = vsel %vm142_vm5, %v144_v30, %v140_v29 }
 0x106   :  { %v155_v31 = vpop.permute.xlu0 %154 }
 0x107   :  { %v157_v33 = vmul.f32 %v155_v31, %v145_v32 }
 0x109   :  { %159 = vrot.lane.b32.xlu1 %v157_v33, %s899_s7 }
 0x17b   :  { %v160_v34 = vpop.permute.xlu1 %159 }
 0x17c   :  { %v162_v35 = vadd.f32 %v160_v34, %v961_v17 }
 0x17e   :  { %798 = vtanh.f32 %v162_v35 }
 0x184   :  { %v799_v36 = vpop.eup %798 }
 0x185   :  { %165 = vrot.lane.b32.xlu1 %v799_v36, %s899_s7 }
 0x1f7   :  { %v166_v37 = vpop.permute.xlu1 %165 }
 0x1f8   :  { %v168_v38 = vsub.f32 %v945_v11, %v166_v37 }
 0x1fa   :  { %170 = vrot.lane.b32.xlu2 %v168_v38, %s900_s2 }
 0x254   :  { %v171_v39 = vpop.permute.xlu2 %170 }
 0x255   :  { %v173_v40 = vmul.f32 %v171_v39, %v145_v32 }
 0x257   :  { %175 = vrot.lane.b32.xlu2 %v173_v40, %s900_s2 }
 0x2b1   :  { %v176_v41 = vpop.permute.xlu2 %175 }
 0x2b2   :  { %v178_v42 = vadd.f32 %v799_v36, %v176_v41 }
 0x2b4   :  { %180 = vrot.lane.b32.xlu0 %v178_v42, %s899_s7 }
 0x326   :  { %v181_v43 = vpop.permute.xlu0 %180 }
 0x327   :  { %184 = vst.msk [vmem:[%s1097_s5] sm:$0x3] %vm56_vm0, %v181_v43  ;;  %763 = vmatmul.msk.f32.vlgmr.msra.gmra.mxu2 %vm68_vm1, %v181_v43 }
 0x3aa   :  { %v204_v44 = vpop.f32.mrf.mxu2 }
 0x3ab   :  { %v230_v45 = vadd.f32 %v204_v44, %v951_v12  ;;  %v208_v47 = vrot.slane %v204_v44, 6 }
 0x3ad   :  { %v232_v46 = vrot.slane %v230_v45, 6  ;;  %v210_v48 = vadd.f32 %v208_v47, %v961_v17 }
 0x3af   :  { %233 = vrot.lane.b32.xlu1 %v232_v46, %s899_s7  ;;  %v764_v49 = vmul.f32 -1.442695, %v210_v48 }
 0x3b1   :  { %800 = vpow2.f32 %v764_v49 }
 0x3b7   :  { %v801_v50 = vpop.eup %800 }
 0x3b8   :  { %v214_v51 = vadd.f32 1.0, %v801_v50 }
 0x3ba   :  { %802 = vrcp.f32 %v214_v51  ;;  %v226_v57 = vand.u32 2147483648, %v214_v51  ;;  %vm220_vm7 = vweird.f32 %v214_v51  ;;  %v224_v58 = vand.u32 2147483647, %v214_v51 }
 0x3bc   :  { %v227_v60 = vor.u32 1.1754944e-38, %v226_v57  ;;  %vm225_vm9 = vcmp.eq.f32.partialorder %v224_v58, 8.507059e+37 }
 0x3c0   :  { %v803_v52 = vpop.eup %802 }
 0x3c1   :  { %v216_v53 = vmul.f32 %v803_v52, %v214_v51  ;;  %vm221_vm6 = vweird.f32 %v803_v52 }
 0x3c2   :  { %vm222_vm8 = vmor %vm220_vm7, %vm221_vm6 }
 0x3c3   :  { %v217_v54 = vsub.f32 1.0, %v216_v53 }
 0x3c5   :  { %v218_v55 = vmul.f32 %v803_v52, %v217_v54 }
 0x3c7   :  { %v219_v56 = vadd.f32 %v803_v52, %v218_v55 }
 0x3c9   :  { %v223_v59 = vsel %vm222_vm8, %v803_v52, %v219_v56 }
 0x3ca   :  { %v228_v62 = vsel %vm225_vm9, %v227_v60, %v223_v59 }
 0x421   :  { %v234_v61 = vpop.permute.xlu1 %233 }
 0x422   :  { %v236_v63 = vmul.f32 %v234_v61, %v228_v62 }
 0x424   :  { %238 = vrot.lane.b32.xlu2 %v236_v63, %s899_s7 }
 0x47e   :  { %v239_v0 = vpop.permute.xlu2 %238 }
 0x47f   :  { %v241_v1 = vadd.f32 %v239_v0, %v961_v17 }
 0x481   :  { %804 = vtanh.f32 %v241_v1 }
 0x487   :  { %v805_v2 = vpop.eup %804 }
 0x488   :  { %v244_v3 = vrot.slane %v805_v2, 2 }
 0x48a   :  { %v246_v4 = vsub.f32 %v178_v42, %v244_v3 }
 0x48c   :  { %v248_v5 = vrot.slane %v246_v4, 6 }
 0x48e   :  { %249 = vrot.lane.b32.xlu0 %v248_v5, %s901_s11 }
 0x500   :  { %v250_v6 = vpop.permute.xlu0 %249 }
 0x501   :  { %v252_v7 = vmul.f32 %v250_v6, %v228_v62 }
 0x503   :  { %254 = vrot.lane.b32.xlu1 %v252_v7, %s900_s2 }
 0x575   :  { %v255_v8 = vpop.permute.xlu1 %254 }
 0x576   :  { %v983_v9 = vadd.f32 %v805_v2, %v255_v8 }
 0x578   :  { %v265_v10 = vrot.slane %v983_v9, 2 }
 0x57a   :  { %266 = vrot.lane.b32.xlu2 %v265_v10, %s899_s7 }
 0x5d4   :  { %v267_v11 = vpop.permute.xlu2 %266 }
 0x5d5   :  { %766 = vmatmul.msk.f32.vlgmr.msra.gmra.mxu3 %vm68_vm1, %v267_v11 }
 0x658   :  { %v287_v13 = vpop.f32.mrf.mxu3 }
 0x659   :  { %v313_v14 = vadd.f32 %v287_v13, %v951_v12  ;;  %v291_v18 = vrot.slane %v287_v13, 4 }
 0x65b   :  { %v315_v16 = vrot.slane %v313_v14, 4  ;;  %v293_v19 = vadd.f32 %v291_v18, %v961_v17 }
 0x65d   :  { %316 = vrot.lane.b32.xlu0 %v315_v16, %s899_s7  ;;  %v767_v20 = vmul.f32 -1.442695, %v293_v19 }
 0x65f   :  { %806 = vpow2.f32 %v767_v20 }
 0x665   :  { %v807_v21 = vpop.eup %806 }
 0x666   :  { %v297_v22 = vadd.f32 1.0, %v807_v21 }
 0x668   :  { %808 = vrcp.f32 %v297_v22  ;;  %v309_v28 = vand.u32 2147483648, %v297_v22  ;;  %vm303_vm11 = vweird.f32 %v297_v22  ;;  %v307_v29 = vand.u32 2147483647, %v297_v22 }
 0x66a   :  { %v310_v31 = vor.u32 1.1754944e-38, %v309_v28  ;;  %vm308_vm13 = vcmp.eq.f32.partialorder %v307_v29, 8.507059e+37 }
 0x66e   :  { %v809_v23 = vpop.eup %808 }
 0x66f   :  { %v299_v24 = vmul.f32 %v809_v23, %v297_v22  ;;  %vm304_vm10 = vweird.f32 %v809_v23 }
 0x670   :  { %vm305_vm12 = vmor %vm303_vm11, %vm304_vm10 }
 0x671   :  { %v300_v25 = vsub.f32 1.0, %v299_v24 }
 0x673   :  { %v301_v26 = vmul.f32 %v809_v23, %v300_v25 }
 0x675   :  { %v302_v27 = vadd.f32 %v809_v23, %v301_v26 }
 0x677   :  { %v306_v30 = vsel %vm305_vm12, %v809_v23, %v302_v27 }
 0x678   :  { %v311_v33 = vsel %vm308_vm13, %v310_v31, %v306_v30 }
 0x6cf   :  { %v317_v32 = vpop.permute.xlu0 %316 }
 0x6d0   :  { %v319_v34 = vmul.f32 %v317_v32, %v311_v33 }
 0x6d2   :  { %321 = vrot.lane.b32.xlu1 %v319_v34, %s899_s7 }
 0x744   :  { %v322_v35 = vpop.permute.xlu1 %321 }
 0x745   :  { %v324_v36 = vadd.f32 %v322_v35, %v961_v17 }
 0x747   :  { %810 = vtanh.f32 %v324_v36 }
 0x74d   :  { %v811_v37 = vpop.eup %810 }
 0x74e   :  { %v327_v38 = vrot.slane %v811_v37, 2 }
 0x750   :  { %v329_v39 = vsub.f32 %v983_v9, %v327_v38 }
 0x752   :  { %v331_v40 = vrot.slane %v329_v39, 6 }
 0x754   :  { %332 = vrot.lane.b32.xlu2 %v331_v40, %s901_s11 }
 0x7ae   :  { %v333_v41 = vpop.permute.xlu2 %332 }
 0x7af   :  { %v335_v42 = vmul.f32 %v333_v41, %v311_v33 }
 0x7b1   :  { %337 = vrot.lane.b32.xlu0 %v335_v42, %s900_s2 }
 0x823   :  { %v338_v43 = vpop.permute.xlu0 %337 }
 0x824   :  { %v996_v44 = vadd.f32 %v811_v37, %v338_v43 }
 0x826   :  { %v348_v45 = vrot.slane %v996_v44, 4 }
 0x828   :  { %349 = vrot.lane.b32.xlu1 %v348_v45, %s899_s7 }
 0x89a   :  { %v350_v46 = vpop.permute.xlu1 %349 }
 0x89b   :  { %769 = vmatmul.msk.f32.vlgmr.msrb.gmra.mxu1 %vm68_vm1, %v350_v46 }
 0x918   :  { %v370_v47 = vpop.f32.mrf.mxu1 }
 0x919   :  { %v396_v48 = vadd.f32 %v370_v47, %v951_v12  ;;  %v374_v50 = vrot.slane %v370_v47, 2 }
 0x91b   :  { %v398_v49 = vrot.slane %v396_v48, 2  ;;  %v376_v51 = vadd.f32 %v374_v50, %v961_v17 }
 0x91d   :  { %399 = vrot.lane.b32.xlu2 %v398_v49, %s899_s7  ;;  %v770_v52 = vmul.f32 -1.442695, %v376_v51 }
 0x91f   :  { %812 = vpow2.f32 %v770_v52 }
 0x925   :  { %v813_v53 = vpop.eup %812 }
 0x926   :  { %v380_v54 = vadd.f32 1.0, %v813_v53 }
 0x928   :  { %814 = vrcp.f32 %v380_v54  ;;  %v392_v60 = vand.u32 2147483648, %v380_v54  ;;  %vm386_vm15 = vweird.f32 %v380_v54  ;;  %v390_v61 = vand.u32 2147483647, %v380_v54 }
 0x92a   :  { %v393_v63 = vor.u32 1.1754944e-38, %v392_v60  ;;  %vm391_vm3 = vcmp.eq.f32.partialorder %v390_v61, 8.507059e+37 }
 0x92e   :  { %v815_v55 = vpop.eup %814 }
 0x92f   :  { %v382_v56 = vmul.f32 %v815_v55, %v380_v54  ;;  %vm387_vm14 = vweird.f32 %v815_v55 }
 0x930   :  { %vm388_vm2 = vmor %vm386_vm15, %vm387_vm14 }
 0x931   :  { %v383_v57 = vsub.f32 1.0, %v382_v56 }
 0x933   :  { %v384_v58 = vmul.f32 %v815_v55, %v383_v57 }
 0x935   :  { %v385_v59 = vadd.f32 %v815_v55, %v384_v58 }
 0x937   :  { %v389_v62 = vsel %vm388_vm2, %v815_v55, %v385_v59 }
 0x938   :  { %v394_v1 = vsel %vm391_vm3, %v393_v63, %v389_v62 }
 0x977   :  { %v400_v0 = vpop.permute.xlu2 %399 }
 0x978   :  { %v402_v2 = vmul.f32 %v400_v0, %v394_v1 }
 0x97a   :  { %404 = vrot.lane.b32.xlu0 %v402_v2, %s899_s7 }
 0x9ec   :  { %v405_v3 = vpop.permute.xlu0 %404 }
 0x9ed   :  { %v407_v4 = vadd.f32 %v405_v3, %v961_v17  ;;  %v59_v17 = vld [vmem:[%s1092_s0 + $0x8] sm:$0xff] }
 0x9ee   :  { %760 = vmatmul.msk.f32.gmra.mxu0 %vm68_vm1, %v59_v17 }
 0x9ef   :  { %816 = vtanh.f32 %v407_v4 }
 0x9f5   :  { %v817_v5 = vpop.eup %816 }
 0x9f6   :  { %v410_v6 = vrot.slane %v817_v5, 2 }
 0x9f8   :  { %v412_v7 = vsub.f32 %v996_v44, %v410_v6 }
 0x9fa   :  { %v414_v8 = vrot.slane %v412_v7, 6 }
 0x9fc   :  { %415 = vrot.lane.b32.xlu1 %v414_v8, %s901_s11 }
 0xa6b   :  { %v95_v21 = vpop.f32.mrf.mxu0 }
 0xa6c   :  { %v1021_v22 = vadd.f32 %v958_v15, %v95_v21 }
 0xa6e   :  { %v416_v10 = vpop.permute.xlu1 %415 }
 0xa6f   :  { %v418_v11 = vmul.f32 %v416_v10, %v394_v1 }
 0xa71   :  { %420 = vrot.lane.b32.xlu2 %v418_v11, %s900_s2 }
 0xacb   :  { %v421_v13 = vpop.permute.xlu2 %420 }
 0xacc   :  { %v1009_v14 = vadd.f32 %v817_v5, %v421_v13 }
 0xace   :  { %v431_v16 = vrot.slane %v1009_v14, 6 }
 0xad0   :  { %432 = vrot.lane.b32.xlu0 %v431_v16, %s899_s7 }
 0xb42   :  { %v433_v18 = vpop.permute.xlu0 %432 }
 0xb43   :  { %772 = vmatmul.msk.f32.vlgmr.msrb.gmra.mxu2 %vm68_vm1, %v433_v18 }
 0xbc6   :  { %v453_v19 = vpop.f32.mrf.mxu2 }
 0xbc7   :  { %v476_v20 = vadd.f32 %v453_v19, %v951_v12  ;;  %v456_v23 = vadd.f32 %v453_v19, %v1021_v22 }
 0xbc9   :  { %478 = vrot.lane.b32.xlu1 %v476_v20, %s899_s7  ;;  %v773_v24 = vmul.f32 -1.442695, %v456_v23 }
 0xbcb   :  { %818 = vpow2.f32 %v773_v24 }
 0xbd1   :  { %v819_v25 = vpop.eup %818 }
 0xbd2   :  { %v460_v26 = vadd.f32 1.0, %v819_v25 }
 0xbd4   :  { %820 = vrcp.f32 %v460_v26  ;;  %v472_v32 = vand.u32 2147483648, %v460_v26  ;;  %vm466_vm5 = vweird.f32 %v460_v26  ;;  %v470_v33 = vand.u32 2147483647, %v460_v26 }
 0xbd6   :  { %v473_v15 = vor.u32 1.1754944e-38, %v472_v32  ;;  %vm471_vm7 = vcmp.eq.f32.partialorder %v470_v33, 8.507059e+37 }
 0xbda   :  { %v821_v27 = vpop.eup %820 }
 0xbdb   :  { %v462_v28 = vmul.f32 %v821_v27, %v460_v26  ;;  %vm467_vm4 = vweird.f32 %v821_v27 }
 0xbdc   :  { %vm468_vm6 = vmor %vm466_vm5, %vm467_vm4  ;;  %vm263_vm4 = vcmask 257026   ;;  %vm346_vm5 = vcmask 259076  }
 0xbdd   :  { %v463_v29 = vsub.f32 1.0, %v462_v28 }
 0xbdf   :  { %v464_v30 = vmul.f32 %v821_v27, %v463_v29 }
 0xbe1   :  { %v465_v31 = vadd.f32 %v821_v27, %v464_v30 }
 0xbe3   :  { %v469_v34 = vsel %vm468_vm6, %v821_v27, %v465_v31  ;;  %vm429_vm6 = vcmask 261126  }
 0xbe4   :  { %v474_v36 = vsel %vm471_vm7, %v473_v15, %v469_v34 }
 0xc3b   :  { %v479_v35 = vpop.permute.xlu1 %478 }
 0xc3c   :  { %v481_v37 = vmul.f32 %v479_v35, %v474_v36 }
 0xc3e   :  { %483 = vrot.lane.b32.xlu2 %v481_v37, %s899_s7 }
 0xc98   :  { %v484_v38 = vpop.permute.xlu2 %483 }
 0xc99   :  { %v486_v39 = vadd.f32 %v484_v38, %v1021_v22 }
 0xc9b   :  { %822 = vtanh.f32 %v486_v39 }
 0xca1   :  { %v823_v40 = vpop.eup %822 }
 0xca2   :  { %v489_v41 = vrot.slane %v823_v40, 2 }
 0xca4   :  { %v491_v42 = vsub.f32 %v1009_v14, %v489_v41 }
 0xca6   :  { %v493_v43 = vrot.slane %v491_v42, 6 }
 0xca8   :  { %494 = vrot.lane.b32.xlu0 %v493_v43, %s901_s11 }
 0xd1a   :  { %v495_v45 = vpop.permute.xlu0 %494 }
 0xd1b   :  { %v497_v46 = vmul.f32 %v495_v45, %v474_v36 }
 0xd1d   :  { %499 = vrot.lane.b32.xlu1 %v497_v46, %s900_s2 }
 0xd8f   :  { %v500_v47 = vpop.permute.xlu1 %499 }
 0xd90   :  { %v502_v48 = vadd.f32 %v823_v40, %v500_v47 }
 0xd92   :  { %504 = vrot.lane.b32.xlu2 %v502_v48, %s899_s7 }
 0xdec   :  { %v505_v49 = vpop.permute.xlu2 %504 }
 0xded   :  { %774 = vst.msk [vmem:[%s1097_s5 + $0x8] sm:$0x3] %vm56_vm0, %v505_v49  ;;  %775 = vmatmul.msk.f32.vlgmr.msrb.gmra.mxu3 %vm68_vm1, %v505_v49 }
 0xe70   :  { %v528_v50 = vpop.f32.mrf.mxu3 }
 0xe71   :  { %v554_v51 = vadd.f32 %v528_v50, %v951_v12  ;;  %v532_v53 = vrot.slane %v528_v50, 6 }
 0xe73   :  { %v556_v52 = vrot.slane %v554_v51, 6  ;;  %v534_v54 = vadd.f32 %v532_v53, %v1021_v22 }
 0xe75   :  { %557 = vrot.lane.b32.xlu0 %v556_v52, %s899_s7  ;;  %v776_v55 = vmul.f32 -1.442695, %v534_v54 }
 0xe77   :  { %824 = vpow2.f32 %v776_v55 }
 0xe7d   :  { %v825_v56 = vpop.eup %824 }
 0xe7e   :  { %v538_v57 = vadd.f32 1.0, %v825_v56 }
 0xe80   :  { %826 = vrcp.f32 %v538_v57  ;;  %v550_v63 = vand.u32 2147483648, %v538_v57  ;;  %vm544_vm8 = vweird.f32 %v538_v57  ;;  %v548_v0 = vand.u32 2147483647, %v538_v57 }
 0xe82   :  { %v551_v2 = vor.u32 1.1754944e-38, %v550_v63  ;;  %vm549_vm10 = vcmp.eq.f32.partialorder %v548_v0, 8.507059e+37 }
 0xe86   :  { %v827_v58 = vpop.eup %826 }
 0xe87   :  { %v540_v59 = vmul.f32 %v827_v58, %v538_v57  ;;  %vm545_vm0 = vweird.f32 %v827_v58 }
 0xe88   :  { %vm546_vm9 = vmor %vm544_vm8, %vm545_vm0 }
 0xe89   :  { %v541_v60 = vsub.f32 1.0, %v540_v59 }
 0xe8b   :  { %v542_v61 = vmul.f32 %v827_v58, %v541_v60 }
 0xe8d   :  { %v543_v62 = vadd.f32 %v827_v58, %v542_v61 }
 0xe8f   :  { %v547_v1 = vsel %vm546_vm9, %v827_v58, %v543_v62 }
 0xe90   :  { %v552_v4 = vsel %vm549_vm10, %v551_v2, %v547_v1 }
 0xee7   :  { %v558_v3 = vpop.permute.xlu0 %557 }
 0xee8   :  { %v560_v5 = vmul.f32 %v558_v3, %v552_v4 }
 0xeea   :  { %562 = vrot.lane.b32.xlu1 %v560_v5, %s899_s7 }
 0xf5c   :  { %v563_v6 = vpop.permute.xlu1 %562 }
 0xf5d   :  { %v565_v7 = vadd.f32 %v563_v6, %v1021_v22 }
 0xf5f   :  { %828 = vtanh.f32 %v565_v7 }
 0xf65   :  { %v829_v8 = vpop.eup %828 }
 0xf66   :  { %v568_v10 = vrot.slane %v829_v8, 2 }
 0xf68   :  { %v570_v11 = vsub.f32 %v502_v48, %v568_v10 }
 0xf6a   :  { %v572_v13 = vrot.slane %v570_v11, 6 }
 0xf6c   :  { %573 = vrot.lane.b32.xlu2 %v572_v13, %s901_s11 }
 0xfc6   :  { %v574_v16 = vpop.permute.xlu2 %573 }
 0xfc7   :  { %v576_v17 = vmul.f32 %v574_v16, %v552_v4 }
 0xfc9   :  { %578 = vrot.lane.b32.xlu0 %v576_v17, %s900_s2 }
0x103b   :  { %v579_v18 = vpop.permute.xlu0 %578 }
0x103c   :  { %v1042_v19 = vadd.f32 %v829_v8, %v579_v18 }
0x103e   :  { %v588_v20 = vrot.slane %v1042_v19, 2 }
0x1040   :  { %589 = vrot.lane.b32.xlu1 %v588_v20, %s899_s7 }
0x10b2   :  { %v590_v21 = vpop.permute.xlu1 %589 }
0x10b3   :  { %778 = vmatmul.msk.f32.vlgmr.msrb.gmra.mxu0 %vm68_vm1, %v590_v21 }
0x1130   :  { %v610_v23 = vpop.f32.mrf.mxu0 }
0x1131   :  { %v636_v24 = vadd.f32 %v610_v23, %v951_v12  ;;  %v614_v26 = vrot.slane %v610_v23, 4 }
0x1133   :  { %v638_v25 = vrot.slane %v636_v24, 4  ;;  %v616_v27 = vadd.f32 %v614_v26, %v1021_v22 }
0x1135   :  { %639 = vrot.lane.b32.xlu2 %v638_v25, %s899_s7  ;;  %v779_v28 = vmul.f32 -1.442695, %v616_v27 }
0x1137   :  { %830 = vpow2.f32 %v779_v28 }
0x113d   :  { %v831_v29 = vpop.eup %830 }
0x113e   :  { %v620_v30 = vadd.f32 1.0, %v831_v29 }
0x1140   :  { %832 = vrcp.f32 %v620_v30  ;;  %v632_v35 = vand.u32 2147483648, %v620_v30  ;;  %vm626_vm12 = vweird.f32 %v620_v30  ;;  %v630_v36 = vand.u32 2147483647, %v620_v30 }
0x1142   :  { %v633_v38 = vor.u32 1.1754944e-38, %v632_v35  ;;  %vm631_vm14 = vcmp.eq.f32.partialorder %v630_v36, 8.507059e+37 }
0x1146   :  { %v833_v31 = vpop.eup %832 }
0x1147   :  { %v622_v32 = vmul.f32 %v833_v31, %v620_v30  ;;  %vm627_vm11 = vweird.f32 %v833_v31 }
0x1148   :  { %vm628_vm13 = vmor %vm626_vm12, %vm627_vm11 }
0x1149   :  { %v623_v33 = vsub.f32 1.0, %v622_v32 }
0x114b   :  { %v624_v34 = vmul.f32 %v833_v31, %v623_v33 }
0x114d   :  { %v625_v15 = vadd.f32 %v833_v31, %v624_v34 }
0x114f   :  { %v629_v37 = vsel %vm628_vm13, %v833_v31, %v625_v15 }
0x1150   :  { %v634_v40 = vsel %vm631_vm14, %v633_v38, %v629_v37 }
0x118f   :  { %v640_v39 = vpop.permute.xlu2 %639 }
0x1190   :  { %v642_v41 = vmul.f32 %v640_v39, %v634_v40 }
0x1192   :  { %644 = vrot.lane.b32.xlu0 %v642_v41, %s899_s7 }
0x1204   :  { %v645_v42 = vpop.permute.xlu0 %644 }
0x1205   :  { %v647_v43 = vadd.f32 %v645_v42, %v1021_v22 }
0x1207   :  { %834 = vtanh.f32 %v647_v43 }
0x120d   :  { %v835_v45 = vpop.eup %834 }
0x120e   :  { %v650_v46 = vrot.slane %v835_v45, 2 }
0x1210   :  { %v652_v47 = vsub.f32 %v1042_v19, %v650_v46 }
0x1212   :  { %v654_v48 = vrot.slane %v652_v47, 6 }
0x1214   :  { %655 = vrot.lane.b32.xlu1 %v654_v48, %s901_s11 }
0x1286   :  { %v656_v49 = vpop.permute.xlu1 %655 }
0x1287   :  { %v658_v50 = vmul.f32 %v656_v49, %v634_v40 }
0x1289   :  { %660 = vrot.lane.b32.xlu2 %v658_v50, %s900_s2 }
0x12e3   :  { %v661_v51 = vpop.permute.xlu2 %660 }
0x12e4   :  { %v663_v52 = vadd.f32 %v835_v45, %v661_v51 }
0x12e6   :  { %v670_v53 = vrot.slane %v663_v52, 4 }
0x12e8   :  { %671 = vrot.lane.b32.xlu0 %v670_v53, %s899_s7 }
0x135a   :  { %v672_v54 = vpop.permute.xlu0 %671 }
0x135b   :  { %781 = vmatmul.msk.f32.vlgmr.msra.gmra.mxu1 %vm68_vm1, %v672_v54 }
0x13d8   :  { %v692_v55 = vpop.f32.mrf.mxu1 }
0x13d9   :  { %v718_v56 = vadd.f32 %v692_v55, %v951_v12  ;;  %v696_v58 = vrot.slane %v692_v55, 2 }
0x13db   :  { %v720_v57 = vrot.slane %v718_v56, 2  ;;  %v698_v59 = vadd.f32 %v696_v58, %v1021_v22 }
0x13dd   :  { %721 = vrot.lane.b32.xlu1 %v720_v57, %s899_s7  ;;  %v782_v60 = vmul.f32 -1.442695, %v698_v59 }
0x13df   :  { %836 = vpow2.f32 %v782_v60 }
0x13e5   :  { %v837_v61 = vpop.eup %836 }
0x13e6   :  { %v702_v62 = vadd.f32 1.0, %v837_v61 }
0x13e8   :  { %838 = vrcp.f32 %v702_v62  ;;  %v714_v4 = vand.u32 2147483648, %v702_v62  ;;  %vm708_vm15 = vweird.f32 %v702_v62  ;;  %v712_v12 = vand.u32 2147483647, %v702_v62 }
0x13ea   :  { %v715_v6 = vor.u32 1.1754944e-38, %v714_v4  ;;  %vm713_vm3 = vcmp.eq.f32.partialorder %v712_v12, 8.507059e+37 }
0x13ee   :  { %v839_v63 = vpop.eup %838 }
0x13ef   :  { %v704_v0 = vmul.f32 %v839_v63, %v702_v62  ;;  %vm709_vm1 = vweird.f32 %v839_v63 }
0x13f0   :  { %vm710_vm2 = vmor %vm708_vm15, %vm709_vm1 }
0x13f1   :  { %v705_v1 = vsub.f32 1.0, %v704_v0 }
0x13f3   :  { %v706_v2 = vmul.f32 %v839_v63, %v705_v1 }
0x13f5   :  { %v707_v3 = vadd.f32 %v839_v63, %v706_v2 }
0x13f7   :  { %v711_v5 = vsel %vm710_vm2, %v839_v63, %v707_v3 }
0x13f8   :  { %v716_v8 = vsel %vm713_vm3, %v715_v6, %v711_v5 }
0x144f   :  { %v722_v7 = vpop.permute.xlu1 %721 }
0x1450   :  { %v724_v10 = vmul.f32 %v722_v7, %v716_v8 }
0x1452   :  { %726 = vrot.lane.b32.xlu2 %v724_v10, %s899_s7 }
0x145a   :  { %259 = vrot.lane.b32.xlu2 %v983_v9, %s899_s7 }
0x1462   :  { %583 = vrot.lane.b32.xlu2 %v1042_v19, %s899_s7 }
0x14ac   :  { %v727_v11 = vpop.permute.xlu2 %726 }
0x14ad   :  { %v729_v13 = vadd.f32 %v727_v11, %v1021_v22 }
0x14af   :  { %840 = vtanh.f32 %v729_v13 }
0x14b4   :  { %v260_v16 = vpop.permute.xlu2 %259 }
0x14b5   :  { %v841_v17 = vpop.eup %840  ;;  %765 = vst.msk [vmem:[%s1097_s5] sm:$0xc] %vm263_vm4, %v260_v16 }
0x14b6   :  { %v732_v18 = vrot.slane %v841_v17, 2 }
0x14b8   :  { %v734_v20 = vsub.f32 %v663_v52, %v732_v18 }
0x14ba   :  { %v736_v21 = vrot.slane %v734_v20, 6 }
0x14bc   :  { %737 = vrot.lane.b32.xlu0 %v736_v21, %s901_s11  ;;  %v584_v9 = vpop.permute.xlu2 %583 }
0x14bd   :  { %777 = vst.msk [vmem:[%s1097_s5 + $0x8] sm:$0xc] %vm263_vm4, %v584_v9 }
0x14c4   :  { %342 = vrot.lane.b32.xlu0 %v996_v44, %s899_s7 }
0x14cc   :  { %665 = vrot.lane.b32.xlu0 %v663_v52, %s899_s7 }
0x152e   :  { %v738_v22 = vpop.permute.xlu0 %737 }
0x152f   :  { %v740_v19 = vmul.f32 %v738_v22, %v716_v8 }
0x1531   :  { %742 = vrot.lane.b32.xlu1 %v740_v19, %s900_s2 }
0x1536   :  { %v343_v23 = vpop.permute.xlu0 %342 }
0x1537   :  { %768 = vst.msk [vmem:[%s1097_s5] sm:$0x30] %vm346_vm5, %v343_v23 }
0x1539   :  { %425 = vrot.lane.b32.xlu1 %v1009_v14, %s899_s7 }
0x153e   :  { %v666_v24 = vpop.permute.xlu0 %665 }
0x153f   :  { %780 = vst.msk [vmem:[%s1097_s5 + $0x8] sm:$0x30] %vm346_vm5, %v666_v24 }
0x15a3   :  { %v743_v44 = vpop.permute.xlu1 %742 }
0x15a4   :  { %v745_v25 = vadd.f32 %v841_v17, %v743_v44 }
0x15a6   :  { %747 = vrot.lane.b32.xlu1 %v745_v25, %s899_s7 }
0x15ab   :  { %v426_v26 = vpop.permute.xlu1 %425 }
0x15ac   :  { %771 = vst.msk [vmem:[%s1097_s5] sm:$0xc0] %vm429_vm6, %v426_v26 }
0x1618   :  { %v748_v27 = vpop.permute.xlu1 %747 }
0x1619   :  { %783 = vst.msk [vmem:[%s1097_s5 + $0x8] sm:$0xc0] %vm429_vm6, %v748_v27 }
0x161a   :  { %752 = vst.msk [vmem:[#allocation2 - $0x6] sm:$0xc0] %vm429_vm6, %v748_v27 }
0x161b   :  { %757 = vsyncpa [#allocation4], 1 }
0x161c   :  { %758 = vsyncpa [#allocation6], 1 }

</bundles_post_ra>
